<compile_context>
chip_gen: v7x
topology: tpu7x:2x2x1
jax: 0.10.0
libtpu: 0.0.40
codegen_flags: <defaults>
</compile_context>

<pallas_src>
import math
from functools import partial

import jax
import jax.numpy as jnp
from jax.experimental import pallas as pl
from jax.experimental.pallas import tpu as pltpu


def _attend(q3, k3, v3, w_out, b_out, num_heads):
    """Multi-head attention on one batch block.

    q3: (b, lq, dV) bf16, k3/v3: (b, lk, dV) bf16, w_out: (dV, dV) bf16,
    b_out: (1, dV) f32.  Returns the out-projected context, (b*lq, dV) f32.
    """
    f32 = jnp.float32
    b, lq, dv = q3.shape
    hd = dv // num_heads
    ctx_heads = []
    for h in range(num_heads):                      # static unroll, num_heads small
        sl = slice(h * hd, (h + 1) * hd)
        s = jnp.einsum('bqd,bkd->bqk', q3[..., sl], k3[..., sl],
                       preferred_element_type=f32)
        s = s - jnp.max(s, axis=-1, keepdims=True)
        p = jnp.exp(s)
        p = p * pl.reciprocal(jnp.sum(p, axis=-1, keepdims=True), approx=True)
        ctx_heads.append(jnp.einsum('bqk,bkd->bqd', p.astype(q3.dtype),
                                    v3[..., sl], preferred_element_type=f32))
    # Single out-projection over the concatenated heads: one K=dV MXU push
    # instead of num_heads K=hd pushes plus a serial f32 add chain.
    ctx = jnp.concatenate(ctx_heads, axis=-1).reshape(b * lq, dv)
    # TODO(synk): with head_dim=8 the score matmuls are only 8-deep and the
    # softmax is lane-sparse when lk < 128; packing heads lane-dense (or
    # transposing scores for the lk=num_inds block) could recover VPU/EUP
    # throughput, but needs relayouts that are not guaranteed to lower cleanly.
    return jnp.dot(ctx.astype(q3.dtype), w_out, preferred_element_type=f32) + b_out


def _gab_kernel(num_heads, n_x, n_lat, dv,
                x_ref, lat_ref,
                w_lat3_ref, b_lat3_ref,
                w_x5_ref, b_x5_ref,
                w_h2_ref, b_h2_ref,
                w_tail_ref, b_tail_ref,
                o_ref):
    """One batch block of GAB: H = gMHA(latent, X); X_hat = gMHA(X, H)."""
    f32 = jnp.float32
    mxu = w_x5_ref.dtype                        # bf16 MXU operands, f32 accumulate

    rows_x = x_ref.shape[0]                     # bblk * n_x
    bblk = rows_x // n_x
    rows_h = bblk * n_lat

    x = x_ref[...].astype(mxu)                  # (bblk*n_x, d_in)
    lat = lat_ref[...].astype(mxu)              # (n_lat, dV)

    # -- every X-dependent projection in one matmul: [k_f | v_f | qp_b | q_b | g_b]
    y_x = jnp.dot(x, w_x5_ref[...], preferred_element_type=f32) + b_x5_ref[...]
    k_f, v_f = y_x[:, 0 * dv:1 * dv], y_x[:, 1 * dv:2 * dv]
    qp_b, q_b = y_x[:, 2 * dv:3 * dv], y_x[:, 3 * dv:4 * dv]
    g_b = y_x[:, 4 * dv:5 * dv]

    # -- latent-side projections, computed ONCE per grid step: [qp_l | q_l | g_l]
    y_l = jnp.dot(lat, w_lat3_ref[...], preferred_element_type=f32) + b_lat3_ref[...]
    qp_l = y_l[:, 0 * dv:1 * dv]
    q_l = y_l[:, 1 * dv:2 * dv]
    g_l = y_l[:, 2 * dv:3 * dv]
    silu_l = g_l * jax.nn.sigmoid(g_l)          # latent gate shared across batch

    # -- tail weights: static ref slices (zero-cost views, then load)
    wout_f = w_tail_ref[0 * dv:1 * dv, :]
    wo_f = w_tail_ref[1 * dv:2 * dv, :]
    wout_b = w_tail_ref[2 * dv:3 * dv, :]
    wo_b = w_tail_ref[3 * dv:4 * dv, :]
    bout_f, bo_f = b_tail_ref[0:1, :], b_tail_ref[1:2, :]
    bout_b, bo_b = b_tail_ref[2:3, :], b_tail_ref[3:4, :]

    # ---- project_forward: H = gated-MHA(Q=latent, K=V=X) ----
    q3 = jnp.broadcast_to(q_l[None].astype(mxu), (bblk, n_lat, dv))
    k3 = k_f.reshape(bblk, n_x, dv).astype(mxu)
    v3 = v_f.reshape(bblk, n_x, dv).astype(mxu)
    a_f = _attend(q3, k3, v3, wout_f, bout_f, num_heads)        # (rows_h, dv) f32

    h = (a_f.reshape(bblk, n_lat, dv) + qp_l[None]).reshape(rows_h, dv)
    h = h + jnp.maximum(
        jnp.dot(h.astype(mxu), wo_f, preferred_element_type=f32) + bo_f, 0.0)
    h = (h.reshape(bblk, n_lat, dv) * silu_l[None]).reshape(rows_h, dv)

    # -- H-side projections for the backward block: [k_b | v_b]
    y_h = (jnp.dot(h.astype(mxu), w_h2_ref[...], preferred_element_type=f32)
           + b_h2_ref[...])
    k_b, v_b = y_h[:, 0:dv], y_h[:, dv:2 * dv]

    # ---- project_backward: X_hat = gated-MHA(Q=X, K=V=H) ----
    q3b = q_b.reshape(bblk, n_x, dv).astype(mxu)
    k3b = k_b.reshape(bblk, n_lat, dv).astype(mxu)
    v3b = v_b.reshape(bblk, n_lat, dv).astype(mxu)
    a_b = _attend(q3b, k3b, v3b, wout_b, bout_b, num_heads)     # (rows_x, dv) f32

    o = qp_b + a_b
    o = o + jnp.maximum(
        jnp.dot(o.astype(mxu), wo_b, preferred_element_type=f32) + bo_b, 0.0)
    o = o * (g_b * jax.nn.sigmoid(g_b))

    # TODO(synk): dV=32 < 128 lanes so the output store is still masked; packing
    # several batch elements along lanes would need an in-kernel relayout that is
    # not guaranteed to lower cleanly on all generations.
    o_ref[...] = o.astype(o_ref.dtype)


def _per_step_vmem_bytes(bblk, n_x, n_lat, d_in, dv, num_heads):
    """Rough per-grid-step VMEM footprint (f32 intermediates + bf16 I/O + weights)."""
    rows_x, rows_h = bblk * n_x, bblk * n_lat
    act = 4 * (rows_x * 5 * dv + rows_h * 3 * dv          # fused projections
               + rows_x * 4 * dv + rows_h * 4 * dv        # attention/residual temps
               + 2 * bblk * num_heads * n_x * n_lat)      # scores + probs
    io = 2 * 2 * (rows_x * d_in + rows_x * dv)            # bf16, double-buffered
    weights = (2 * (d_in * 5 * dv + dv * 3 * dv + dv * 2 * dv + 4 * dv * dv)
               + 4 * 14 * dv + 2 * n_lat * dv)
    return act + io + weights


def _pick_bblk(B, n_x, n_lat, d_in, dv, num_heads, vmem_budget=24 * 1024 * 1024):
    """Batch elements per grid step.

    Prefer the largest proper divisor of B (>= 2 grid steps keeps both v7x
    TensorCores busy and enables input/output double-buffering) whose per-step
    footprint fits the VMEM budget and whose row dimension stays (8,*)-tileable;
    fall back to the whole batch in one step otherwise."""
    for d in range(B - 1, 0, -1):
        if B % d:
            continue
        if (d * n_x) % 8:
            continue
        if _per_step_vmem_bytes(d, n_x, n_lat, d_in, dv, num_heads) > vmem_budget:
            continue
        return d
    return B


def fuse_gab_params(pf, pb, num_heads, mxu_dtype=jnp.bfloat16):
    """Fold fc_q/fc_k/fc_v into the nn.MultiheadAttention in-projection, fold the
    1/sqrt(head_dim) scale into the attention-q weights, and concatenate the
    projections per source activation (latent / X / H).  Done once, outside the
    kernel."""
    dV = pf['wq'].shape[1]
    scale = 1.0 / math.sqrt(dV // num_heads)

    def fq(p):  # fc_q folded into in-proj q, attention scale folded in
        return (p['wq'] @ p['wiq']) * scale, (p['bq'] @ p['wiq'] + p['biq']) * scale

    def fk(p):
        return p['wk'] @ p['wik'], p['bk'] @ p['wik'] + p['bik']

    def fv(p):
        return p['wv'] @ p['wiv'], p['bv'] @ p['wiv'] + p['biv']

    wqf_f, bqf_f = fq(pf)
    wkf_f, bkf_f = fk(pf)
    wvf_f, bvf_f = fv(pf)
    wqf_b, bqf_b = fq(pb)
    wkf_b, bkf_b = fk(pb)
    wvf_b, bvf_b = fv(pb)

    w_lat3 = jnp.concatenate([pf['wq'], wqf_f, pf['wg']], axis=1)      # (dV, 3dV)
    b_lat3 = jnp.concatenate([pf['bq'], bqf_f, pf['bg']], axis=1)
    w_x5 = jnp.concatenate([wkf_f, wvf_f, pb['wq'], wqf_b, pb['wg']], axis=1)
    b_x5 = jnp.concatenate([bkf_f, bvf_f, pb['bq'], bqf_b, pb['bg']], axis=1)
    w_h2 = jnp.concatenate([wkf_b, wvf_b], axis=1)                     # (dV, 2dV)
    b_h2 = jnp.concatenate([bkf_b, bvf_b], axis=1)
    w_tail = jnp.concatenate([pf['wout'], pf['wo'], pb['wout'], pb['wo']], axis=0)
    b_tail = jnp.concatenate([pf['bout'], pf['bo'], pb['bout'], pb['bo']], axis=0)

    f32 = jnp.float32
    return dict(
        w_lat3=w_lat3.astype(mxu_dtype), b_lat3=b_lat3.astype(f32),
        w_x5=w_x5.astype(mxu_dtype), b_x5=b_x5.astype(f32),
        w_h2=w_h2.astype(mxu_dtype), b_h2=b_h2.astype(f32),
        w_tail=w_tail.astype(mxu_dtype), b_tail=b_tail.astype(f32),
    )


def init_mha_params(key, dim_Q, dim_K, dim_V):
    """Deterministic init (shapes match the PyTorch module's parameters)."""
    keys = jax.random.split(key, 9)

    def linear(k, din, dout):
        k_w, k_b = jax.random.split(k)
        lim = 1.0 / math.sqrt(din)
        w = jax.random.uniform(k_w, (din, dout), jnp.float32, -lim, lim)
        b = jax.random.uniform(k_b, (1, dout), jnp.float32, -lim, lim)
        return w, b

    p = {}
    p['wq'], p['bq'] = linear(keys[0], dim_Q, dim_V)           # fc_q
    p['wk'], p['bk'] = linear(keys[1], dim_K, dim_V)           # fc_k
    p['wv'], p['bv'] = linear(keys[2], dim_K, dim_V)           # fc_v
    p['wiq'], p['biq'] = linear(keys[3], dim_V, dim_V)         # in_proj (q part)
    p['wik'], p['bik'] = linear(keys[4], dim_V, dim_V)         # in_proj (k part)
    p['wiv'], p['biv'] = linear(keys[5], dim_V, dim_V)         # in_proj (v part)
    p['wout'], p['bout'] = linear(keys[6], dim_V, dim_V)       # attn out_proj
    p['wo'], p['bo'] = linear(keys[7], dim_V, dim_V)           # fc_o
    p['wg'], p['bg'] = linear(keys[8], dim_Q, dim_V)           # gate Linear
    return p


def gab_forward(X, latent, pf_params, pb_params, num_heads):
    """GAB.forward: H = project_forward(latent, X); X_hat = project_backward(X, H).
    Both gated-MHA blocks run inside one fused Pallas kernel (H stays in VMEM)."""
    B, N, d_in = X.shape
    n_lat, d_out = latent.shape[1], latent.shape[2]
    dv = d_out
    assert dv % num_heads == 0

    fused = fuse_gab_params(pf_params, pb_params, num_heads)
    weights = [fused[k] for k in ('w_lat3', 'b_lat3', 'w_x5', 'b_x5',
                                  'w_h2', 'b_h2', 'w_tail', 'b_tail')]

    # Activations cross HBM in bf16 (f32 accumulation / softmax in-kernel).
    x_flat = X.reshape(B * N, d_in).astype(jnp.bfloat16)
    lat2 = latent.reshape(n_lat, d_out).astype(jnp.bfloat16)

    bblk = _pick_bblk(B, N, n_lat, d_in, dv, num_heads)
    grid = (B // bblk,)
    steps = B // bblk

    def row_spec(rows, d):
        return pl.BlockSpec((rows, d), lambda b: (b, 0))

    def resident(shape):
        return pl.BlockSpec(shape, lambda b: (0, 0))

    # Advisory cost hint for XLA's scheduler.
    flops = 2 * (B * N * d_in * 5 * dv
                 + steps * n_lat * dv * 3 * dv
                 + 2 * B * n_lat * N * dv
                 + 2 * B * n_lat * dv * dv
                 + B * n_lat * dv * 2 * dv
                 + 2 * B * N * n_lat * dv
                 + 2 * B * N * dv * dv)
    transcendentals = (2 * B * num_heads * n_lat * N
                       + steps * n_lat * dv + B * N * dv
                       + 2 * B * num_heads * (n_lat + N))
    bytes_accessed = (x_flat.size * 2 + lat2.size * 2 + B * N * dv * 2
                      + sum(int(w.size) * jnp.dtype(w.dtype).itemsize
                            for w in weights))

    step_bytes = _per_step_vmem_bytes(bblk, N, n_lat, d_in, dv, num_heads)
    vmem_limit = int(min(48 * 2 ** 20, max(16 * 2 ** 20, 2 * step_bytes)))

    out_flat = pl.pallas_call(
        partial(_gab_kernel, num_heads, N, n_lat, dv),
        out_shape=jax.ShapeDtypeStruct((B * N, dv), jnp.bfloat16),
        grid=grid,
        in_specs=([row_spec(bblk * N, d_in), resident((n_lat, d_out))]
                  + [resident(w.shape) for w in weights]),
        out_specs=row_spec(bblk * N, dv),
        compiler_params=pltpu.CompilerParams(
            dimension_semantics=("parallel",),
            vmem_limit_bytes=vmem_limit),
        cost_estimate=pl.CostEstimate(
            flops=int(flops), transcendentals=int(transcendentals),
            bytes_accessed=int(bytes_accessed)),
    )(x_flat, lat2, *weights)

    # Kernel stores bf16 (halves masked-store / HBM traffic); restore the
    # module's f32 output dtype outside the kernel.
    return out_flat.reshape(B, N, dv).astype(X.dtype)


if __name__ == "__main__":
    B, N = 2, 16
    dim_in, dim_out = 32, 32
    num_heads, num_inds = 4, 8

    key = jax.random.PRNGKey(0)
    k_x, k_lat, k_pf, k_pb = jax.random.split(key, 4)

    X = jax.random.normal(k_x, (B, N, dim_in), jnp.float32)

    # nn.Parameter latent (1, num_inds, dim_out), xavier_uniform-style bound.
    lim = math.sqrt(6.0 / (num_inds + dim_out))
    latent = jax.random.uniform(k_lat, (1, num_inds, dim_out), jnp.float32, -lim, lim)

    # project_forward: MHA(dim_Q=dim_out, dim_K=dim_in, dim_V=dim_out, gated=True)
    pf_params = init_mha_params(k_pf, dim_out, dim_in, dim_out)
    # project_backward: MHA(dim_Q=dim_in, dim_K=dim_out, dim_V=dim_out, gated=True)
    pb_params = init_mha_params(k_pb, dim_in, dim_out, dim_out)

    fwd = jax.jit(partial(gab_forward, num_heads=num_heads))
    X_hat = jax.block_until_ready(fwd(X, latent, pf_params, pb_params))
    assert X_hat.shape == (B, N, dim_out)
    assert bool(jnp.all(jnp.isfinite(X_hat)))
    print("KERNEL_OK")
</pallas_src>

<mosaic_0001>
module attributes {stable_mosaic.version = 11 : i64} {
  func.func @_gab_kernel(%arg0: i32, %arg1: memref<16x32xbf16, #tpu.memory_space<vmem>>, %arg2: memref<8x32xbf16, #tpu.memory_space<vmem>>, %arg3: memref<32x96xbf16, #tpu.memory_space<vmem>>, %arg4: memref<1x96xf32, #tpu.memory_space<vmem>>, %arg5: memref<32x160xbf16, #tpu.memory_space<vmem>>, %arg6: memref<1x160xf32, #tpu.memory_space<vmem>>, %arg7: memref<32x64xbf16, #tpu.memory_space<vmem>>, %arg8: memref<1x64xf32, #tpu.memory_space<vmem>>, %arg9: memref<128x32xbf16, #tpu.memory_space<vmem>>, %arg10: memref<4x32xf32, #tpu.memory_space<vmem>>, %arg11: memref<16x32xbf16, #tpu.memory_space<vmem>>) attributes {dimension_semantics = [#tpu.dimension_semantics<parallel>], iteration_bounds = array<i64: 2>, scalar_prefetch = 0 : i64, scratch_operands = 0 : i64, tpu.core_type = #tpu.core_type<tc>, window_params = [{transform_indices = @transform_0, window_bounds = array<i64: 16, 32>}, {pipeline_mode = #tpu.pipeline_mode<synchronous>, transform_indices = @transform_1, window_bounds = array<i64: 8, 32>}, {pipeline_mode = #tpu.pipeline_mode<synchronous>, transform_indices = @transform_2, window_bounds = array<i64: 32, 96>}, {pipeline_mode = #tpu.pipeline_mode<synchronous>, transform_indices = @transform_3, window_bounds = array<i64: 1, 96>}, {pipeline_mode = #tpu.pipeline_mode<synchronous>, transform_indices = @transform_4, window_bounds = array<i64: 32, 160>}, {pipeline_mode = #tpu.pipeline_mode<synchronous>, transform_indices = @transform_5, window_bounds = array<i64: 1, 160>}, {pipeline_mode = #tpu.pipeline_mode<synchronous>, transform_indices = @transform_6, window_bounds = array<i64: 32, 64>}, {pipeline_mode = #tpu.pipeline_mode<synchronous>, transform_indices = @transform_7, window_bounds = array<i64: 1, 64>}, {pipeline_mode = #tpu.pipeline_mode<synchronous>, transform_indices = @transform_8, window_bounds = array<i64: 128, 32>}, {pipeline_mode = #tpu.pipeline_mode<synchronous>, transform_indices = @transform_9, window_bounds = array<i64: 4, 32>}, {transform_indices = @transform_10, window_bounds = array<i64: 16, 32>}]} {
    %c0 = arith.constant 0 : index
    %c0_0 = arith.constant 0 : index
    %0 = vector.load %arg1[%c0, %c0_0] : memref<16x32xbf16, #tpu.memory_space<vmem>>, vector<16x32xbf16>
    %c0_1 = arith.constant 0 : index
    %c0_2 = arith.constant 0 : index
    %1 = vector.load %arg2[%c0_1, %c0_2] : memref<8x32xbf16, #tpu.memory_space<vmem>>, vector<8x32xbf16>
    %c0_3 = arith.constant 0 : index
    %c0_4 = arith.constant 0 : index
    %2 = vector.load %arg5[%c0_3, %c0_4] : memref<32x160xbf16, #tpu.memory_space<vmem>>, vector<32x160xbf16>
    %cst = arith.constant dense<0.000000e+00> : vector<16x160xf32>
    %3 = tpu.matmul %0, %2, %cst {dimension_numbers = #tpu.dot_dimension_numbers<[1], [0], [0], [1], [0, 0, 1, 1], [], []>} : vector<16x32xbf16>, vector<32x160xbf16>, vector<16x160xf32> -> vector<16x160xf32>
    %c0_5 = arith.constant 0 : index
    %c0_6 = arith.constant 0 : index
    %4 = vector.load %arg6[%c0_5, %c0_6] : memref<1x160xf32, #tpu.memory_space<vmem>>, vector<1x160xf32>
    %5 = vector.broadcast %4 : vector<1x160xf32> to vector<16x160xf32>
    %6 = arith.addf %3, %5 : vector<16x160xf32>
    %7 = vector.extract_strided_slice %6 {offsets = [0, 0], sizes = [16, 32], strides = [1, 1]} : vector<16x160xf32> to vector<16x32xf32>
    %8 = vector.extract_strided_slice %6 {offsets = [0, 32], sizes = [16, 32], strides = [1, 1]} : vector<16x160xf32> to vector<16x32xf32>
    %9 = vector.extract_strided_slice %6 {offsets = [0, 64], sizes = [16, 32], strides = [1, 1]} : vector<16x160xf32> to vector<16x32xf32>
    %10 = vector.extract_strided_slice %6 {offsets = [0, 96], sizes = [16, 32], strides = [1, 1]} : vector<16x160xf32> to vector<16x32xf32>
    %11 = vector.extract_strided_slice %6 {offsets = [0, 128], sizes = [16, 32], strides = [1, 1]} : vector<16x160xf32> to vector<16x32xf32>
    %c0_7 = arith.constant 0 : index
    %c0_8 = arith.constant 0 : index
    %12 = vector.load %arg3[%c0_7, %c0_8] : memref<32x96xbf16, #tpu.memory_space<vmem>>, vector<32x96xbf16>
    %cst_9 = arith.constant dense<0.000000e+00> : vector<8x96xf32>
    %13 = tpu.matmul %1, %12, %cst_9 {dimension_numbers = #tpu.dot_dimension_numbers<[1], [0], [0], [1], [0, 0, 1, 1], [], []>} : vector<8x32xbf16>, vector<32x96xbf16>, vector<8x96xf32> -> vector<8x96xf32>
    %c0_10 = arith.constant 0 : index
    %c0_11 = arith.constant 0 : index
    %14 = vector.load %arg4[%c0_10, %c0_11] : memref<1x96xf32, #tpu.memory_space<vmem>>, vector<1x96xf32>
    %15 = vector.broadcast %14 : vector<1x96xf32> to vector<8x96xf32>
    %16 = arith.addf %13, %15 : vector<8x96xf32>
    %17 = vector.extract_strided_slice %16 {offsets = [0, 0], sizes = [8, 32], strides = [1, 1]} : vector<8x96xf32> to vector<8x32xf32>
    %18 = vector.extract_strided_slice %16 {offsets = [0, 32], sizes = [8, 32], strides = [1, 1]} : vector<8x96xf32> to vector<8x32xf32>
    %19 = vector.extract_strided_slice %16 {offsets = [0, 64], sizes = [8, 32], strides = [1, 1]} : vector<8x96xf32> to vector<8x32xf32>
    %20 = arith.negf %19 : vector<8x32xf32>
    %21 = math.exp %20 : vector<8x32xf32>
    %cst_12 = arith.constant 1.000000e+00 : f32
    %22 = vector.broadcast %cst_12 : f32 to vector<8x32xf32>
    %23 = arith.addf %22, %21 : vector<8x32xf32>
    %24 = arith.divf %22, %23 : vector<8x32xf32>
    %25 = arith.mulf %19, %24 : vector<8x32xf32>
    %c0_13 = arith.constant 0 : index
    %c0_14 = arith.constant 0 : index
    %26 = vector.load %arg9[%c0_13, %c0_14] : memref<128x32xbf16, #tpu.memory_space<vmem>>, vector<32x32xbf16>
    %c32 = arith.constant 32 : index
    %c0_15 = arith.constant 0 : index
    %27 = vector.load %arg9[%c32, %c0_15] : memref<128x32xbf16, #tpu.memory_space<vmem>>, vector<32x32xbf16>
    %c64 = arith.constant 64 : index
    %c0_16 = arith.constant 0 : index
    %28 = vector.load %arg9[%c64, %c0_16] : memref<128x32xbf16, #tpu.memory_space<vmem>>, vector<32x32xbf16>
    %c96 = arith.constant 96 : index
    %c0_17 = arith.constant 0 : index
    %29 = vector.load %arg9[%c96, %c0_17] : memref<128x32xbf16, #tpu.memory_space<vmem>>, vector<32x32xbf16>
    %c0_18 = arith.constant 0 : index
    %c0_19 = arith.constant 0 : index
    %30 = vector.load %arg10[%c0_18, %c0_19] : memref<4x32xf32, #tpu.memory_space<vmem>>, vector<1x32xf32>
    %c1 = arith.constant 1 : index
    %c0_20 = arith.constant 0 : index
    %31 = vector.load %arg10[%c1, %c0_20] : memref<4x32xf32, #tpu.memory_space<vmem>>, vector<1x32xf32>
    %c2 = arith.constant 2 : index
    %c0_21 = arith.constant 0 : index
    %32 = vector.load %arg10[%c2, %c0_21] : memref<4x32xf32, #tpu.memory_space<vmem>>, vector<1x32xf32>
    %c3 = arith.constant 3 : index
    %c0_22 = arith.constant 0 : index
    %33 = vector.load %arg10[%c3, %c0_22] : memref<4x32xf32, #tpu.memory_space<vmem>>, vector<1x32xf32>
    %34 = vector.shape_cast %18 : vector<8x32xf32> to vector<1x8x32xf32>
    %35 = arith.truncf %34 : vector<1x8x32xf32> to vector<1x8x32xbf16>
    %36 = vector.shape_cast %7 : vector<16x32xf32> to vector<1x16x32xf32>
    %37 = arith.truncf %36 : vector<1x16x32xf32> to vector<1x16x32xbf16>
    %38 = vector.shape_cast %8 : vector<16x32xf32> to vector<1x16x32xf32>
    %39 = arith.truncf %38 : vector<1x16x32xf32> to vector<1x16x32xbf16>
    %40 = vector.extract_strided_slice %35 {offsets = [0, 0, 0], sizes = [1, 8, 8], strides = [1, 1, 1]} : vector<1x8x32xbf16> to vector<1x8x8xbf16>
    %41 = vector.extract_strided_slice %37 {offsets = [0, 0, 0], sizes = [1, 16, 8], strides = [1, 1, 1]} : vector<1x16x32xbf16> to vector<1x16x8xbf16>
    "tpu.trace_start"() <{level = 10 : i32, message = "bqd,bkd->bqk"}> : () -> ()
    %cst_23 = arith.constant dense<0.000000e+00> : vector<1x8x16xf32>
    %42 = tpu.matmul %40, %41, %cst_23 {dimension_numbers = #tpu.dot_dimension_numbers<[2], [2], [1], [1], [0, 0, 0, 1, 1, 1], [0], [0]>} : vector<1x8x8xbf16>, vector<1x16x8xbf16>, vector<1x8x16xf32> -> vector<1x8x16xf32>
    "tpu.trace_stop"() : () -> ()
    %cst_24 = arith.constant dense<0xFF800000> : vector<1x8xf32>
    %43 = vector.multi_reduction <maximumf>, %42, %cst_24 [2] : vector<1x8x16xf32> to vector<1x8xf32>
    %44 = vector.shape_cast %43 : vector<1x8xf32> to vector<1x8x1xf32>
    %45 = vector.broadcast %44 : vector<1x8x1xf32> to vector<1x8x16xf32>
    %46 = arith.subf %42, %45 : vector<1x8x16xf32>
    %47 = math.exp %46 : vector<1x8x16xf32>
    %cst_25 = arith.constant dense<0.000000e+00> : vector<1x8xf32>
    %48 = vector.multi_reduction <add>, %47, %cst_25 [2] : vector<1x8x16xf32> to vector<1x8xf32>
    %49 = vector.shape_cast %48 : vector<1x8xf32> to vector<1x8x1xf32>
    %50 = tpu.reciprocal %49 {approx = true} : vector<1x8x1xf32> -> vector<1x8x1xf32>
    %51 = vector.broadcast %50 : vector<1x8x1xf32> to vector<1x8x16xf32>
    %52 = arith.mulf %47, %51 : vector<1x8x16xf32>
    %53 = arith.truncf %52 : vector<1x8x16xf32> to vector<1x8x16xbf16>
    %54 = vector.extract_strided_slice %39 {offsets = [0, 0, 0], sizes = [1, 16, 8], strides = [1, 1, 1]} : vector<1x16x32xbf16> to vector<1x16x8xbf16>
    "tpu.trace_start"() <{level = 10 : i32, message = "bqk,bkd->bqd"}> : () -> ()
    %cst_26 = arith.constant dense<0.000000e+00> : vector<1x8x8xf32>
    %55 = tpu.matmul %53, %54, %cst_26 {dimension_numbers = #tpu.dot_dimension_numbers<[2], [1], [1], [2], [0, 0, 0, 1, 1, 2], [0], [0]>} : vector<1x8x16xbf16>, vector<1x16x8xbf16>, vector<1x8x8xf32> -> vector<1x8x8xf32>
    "tpu.trace_stop"() : () -> ()
    %56 = vector.extract_strided_slice %35 {offsets = [0, 0, 8], sizes = [1, 8, 8], strides = [1, 1, 1]} : vector<1x8x32xbf16> to vector<1x8x8xbf16>
    %57 = vector.extract_strided_slice %37 {offsets = [0, 0, 8], sizes = [1, 16, 8], strides = [1, 1, 1]} : vector<1x16x32xbf16> to vector<1x16x8xbf16>
    "tpu.trace_start"() <{level = 10 : i32, message = "bqd,bkd->bqk"}> : () -> ()
    %cst_27 = arith.constant dense<0.000000e+00> : vector<1x8x16xf32>
    %58 = tpu.matmul %56, %57, %cst_27 {dimension_numbers = #tpu.dot_dimension_numbers<[2], [2], [1], [1], [0, 0, 0, 1, 1, 1], [0], [0]>} : vector<1x8x8xbf16>, vector<1x16x8xbf16>, vector<1x8x16xf32> -> vector<1x8x16xf32>
    "tpu.trace_stop"() : () -> ()
    %cst_28 = arith.constant dense<0xFF800000> : vector<1x8xf32>
    %59 = vector.multi_reduction <maximumf>, %58, %cst_28 [2] : vector<1x8x16xf32> to vector<1x8xf32>
    %60 = vector.shape_cast %59 : vector<1x8xf32> to vector<1x8x1xf32>
    %61 = vector.broadcast %60 : vector<1x8x1xf32> to vector<1x8x16xf32>
    %62 = arith.subf %58, %61 : vector<1x8x16xf32>
    %63 = math.exp %62 : vector<1x8x16xf32>
    %cst_29 = arith.constant dense<0.000000e+00> : vector<1x8xf32>
    %64 = vector.multi_reduction <add>, %63, %cst_29 [2] : vector<1x8x16xf32> to vector<1x8xf32>
    %65 = vector.shape_cast %64 : vector<1x8xf32> to vector<1x8x1xf32>
    %66 = tpu.reciprocal %65 {approx = true} : vector<1x8x1xf32> -> vector<1x8x1xf32>
    %67 = vector.broadcast %66 : vector<1x8x1xf32> to vector<1x8x16xf32>
    %68 = arith.mulf %63, %67 : vector<1x8x16xf32>
    %69 = arith.truncf %68 : vector<1x8x16xf32> to vector<1x8x16xbf16>
    %70 = vector.extract_strided_slice %39 {offsets = [0, 0, 8], sizes = [1, 16, 8], strides = [1, 1, 1]} : vector<1x16x32xbf16> to vector<1x16x8xbf16>
    "tpu.trace_start"() <{level = 10 : i32, message = "bqk,bkd->bqd"}> : () -> ()
    %cst_30 = arith.constant dense<0.000000e+00> : vector<1x8x8xf32>
    %71 = tpu.matmul %69, %70, %cst_30 {dimension_numbers = #tpu.dot_dimension_numbers<[2], [1], [1], [2], [0, 0, 0, 1, 1, 2], [0], [0]>} : vector<1x8x16xbf16>, vector<1x16x8xbf16>, vector<1x8x8xf32> -> vector<1x8x8xf32>
    "tpu.trace_stop"() : () -> ()
    %72 = vector.extract_strided_slice %35 {offsets = [0, 0, 16], sizes = [1, 8, 8], strides = [1, 1, 1]} : vector<1x8x32xbf16> to vector<1x8x8xbf16>
    %73 = vector.extract_strided_slice %37 {offsets = [0, 0, 16], sizes = [1, 16, 8], strides = [1, 1, 1]} : vector<1x16x32xbf16> to vector<1x16x8xbf16>
    "tpu.trace_start"() <{level = 10 : i32, message = "bqd,bkd->bqk"}> : () -> ()
    %cst_31 = arith.constant dense<0.000000e+00> : vector<1x8x16xf32>
    %74 = tpu.matmul %72, %73, %cst_31 {dimension_numbers = #tpu.dot_dimension_numbers<[2], [2], [1], [1], [0, 0, 0, 1, 1, 1], [0], [0]>} : vector<1x8x8xbf16>, vector<1x16x8xbf16>, vector<1x8x16xf32> -> vector<1x8x16xf32>
    "tpu.trace_stop"() : () -> ()
    %cst_32 = arith.constant dense<0xFF800000> : vector<1x8xf32>
    %75 = vector.multi_reduction <maximumf>, %74, %cst_32 [2] : vector<1x8x16xf32> to vector<1x8xf32>
    %76 = vector.shape_cast %75 : vector<1x8xf32> to vector<1x8x1xf32>
    %77 = vector.broadcast %76 : vector<1x8x1xf32> to vector<1x8x16xf32>
    %78 = arith.subf %74, %77 : vector<1x8x16xf32>
    %79 = math.exp %78 : vector<1x8x16xf32>
    %cst_33 = arith.constant dense<0.000000e+00> : vector<1x8xf32>
    %80 = vector.multi_reduction <add>, %79, %cst_33 [2] : vector<1x8x16xf32> to vector<1x8xf32>
    %81 = vector.shape_cast %80 : vector<1x8xf32> to vector<1x8x1xf32>
    %82 = tpu.reciprocal %81 {approx = true} : vector<1x8x1xf32> -> vector<1x8x1xf32>
    %83 = vector.broadcast %82 : vector<1x8x1xf32> to vector<1x8x16xf32>
    %84 = arith.mulf %79, %83 : vector<1x8x16xf32>
    %85 = arith.truncf %84 : vector<1x8x16xf32> to vector<1x8x16xbf16>
    %86 = vector.extract_strided_slice %39 {offsets = [0, 0, 16], sizes = [1, 16, 8], strides = [1, 1, 1]} : vector<1x16x32xbf16> to vector<1x16x8xbf16>
    "tpu.trace_start"() <{level = 10 : i32, message = "bqk,bkd->bqd"}> : () -> ()
    %cst_34 = arith.constant dense<0.000000e+00> : vector<1x8x8xf32>
    %87 = tpu.matmul %85, %86, %cst_34 {dimension_numbers = #tpu.dot_dimension_numbers<[2], [1], [1], [2], [0, 0, 0, 1, 1, 2], [0], [0]>} : vector<1x8x16xbf16>, vector<1x16x8xbf16>, vector<1x8x8xf32> -> vector<1x8x8xf32>
    "tpu.trace_stop"() : () -> ()
    %88 = vector.extract_strided_slice %35 {offsets = [0, 0, 24], sizes = [1, 8, 8], strides = [1, 1, 1]} : vector<1x8x32xbf16> to vector<1x8x8xbf16>
    %89 = vector.extract_strided_slice %37 {offsets = [0, 0, 24], sizes = [1, 16, 8], strides = [1, 1, 1]} : vector<1x16x32xbf16> to vector<1x16x8xbf16>
    "tpu.trace_start"() <{level = 10 : i32, message = "bqd,bkd->bqk"}> : () -> ()
    %cst_35 = arith.constant dense<0.000000e+00> : vector<1x8x16xf32>
    %90 = tpu.matmul %88, %89, %cst_35 {dimension_numbers = #tpu.dot_dimension_numbers<[2], [2], [1], [1], [0, 0, 0, 1, 1, 1], [0], [0]>} : vector<1x8x8xbf16>, vector<1x16x8xbf16>, vector<1x8x16xf32> -> vector<1x8x16xf32>
    "tpu.trace_stop"() : () -> ()
    %cst_36 = arith.constant dense<0xFF800000> : vector<1x8xf32>
    %91 = vector.multi_reduction <maximumf>, %90, %cst_36 [2] : vector<1x8x16xf32> to vector<1x8xf32>
    %92 = vector.shape_cast %91 : vector<1x8xf32> to vector<1x8x1xf32>
    %93 = vector.broadcast %92 : vector<1x8x1xf32> to vector<1x8x16xf32>
    %94 = arith.subf %90, %93 : vector<1x8x16xf32>
    %95 = math.exp %94 : vector<1x8x16xf32>
    %cst_37 = arith.constant dense<0.000000e+00> : vector<1x8xf32>
    %96 = vector.multi_reduction <add>, %95, %cst_37 [2] : vector<1x8x16xf32> to vector<1x8xf32>
    %97 = vector.shape_cast %96 : vector<1x8xf32> to vector<1x8x1xf32>
    %98 = tpu.reciprocal %97 {approx = true} : vector<1x8x1xf32> -> vector<1x8x1xf32>
    %99 = vector.broadcast %98 : vector<1x8x1xf32> to vector<1x8x16xf32>
    %100 = arith.mulf %95, %99 : vector<1x8x16xf32>
    %101 = arith.truncf %100 : vector<1x8x16xf32> to vector<1x8x16xbf16>
    %102 = vector.extract_strided_slice %39 {offsets = [0, 0, 24], sizes = [1, 16, 8], strides = [1, 1, 1]} : vector<1x16x32xbf16> to vector<1x16x8xbf16>
    "tpu.trace_start"() <{level = 10 : i32, message = "bqk,bkd->bqd"}> : () -> ()
    %cst_38 = arith.constant dense<0.000000e+00> : vector<1x8x8xf32>
    %103 = tpu.matmul %101, %102, %cst_38 {dimension_numbers = #tpu.dot_dimension_numbers<[2], [1], [1], [2], [0, 0, 0, 1, 1, 2], [0], [0]>} : vector<1x8x16xbf16>, vector<1x16x8xbf16>, vector<1x8x8xf32> -> vector<1x8x8xf32>
    "tpu.trace_stop"() : () -> ()
    %104 = tpu.concatenate %55, %71, %87, %103 in 2 : vector<1x8x8xf32>, vector<1x8x8xf32>, vector<1x8x8xf32>, vector<1x8x8xf32> -> vector<1x8x32xf32>
    %105 = vector.shape_cast %104 : vector<1x8x32xf32> to vector<8x32xf32>
    %106 = arith.truncf %105 : vector<8x32xf32> to vector<8x32xbf16>
    %cst_39 = arith.constant dense<0.000000e+00> : vector<8x32xf32>
    %107 = tpu.matmul %106, %26, %cst_39 {dimension_numbers = #tpu.dot_dimension_numbers<[1], [0], [0], [1], [0, 0, 1, 1], [], []>} : vector<8x32xbf16>, vector<32x32xbf16>, vector<8x32xf32> -> vector<8x32xf32>
    %108 = vector.broadcast %30 : vector<1x32xf32> to vector<8x32xf32>
    %109 = arith.addf %107, %108 : vector<8x32xf32>
    %110 = vector.shape_cast %109 : vector<8x32xf32> to vector<1x8x32xf32>
    %111 = vector.shape_cast %17 : vector<8x32xf32> to vector<1x8x32xf32>
    %112 = arith.addf %110, %111 : vector<1x8x32xf32>
    %113 = vector.shape_cast %112 : vector<1x8x32xf32> to vector<8x32xf32>
    %114 = arith.truncf %113 : vector<8x32xf32> to vector<8x32xbf16>
    %cst_40 = arith.constant dense<0.000000e+00> : vector<8x32xf32>
    %115 = tpu.matmul %114, %27, %cst_40 {dimension_numbers = #tpu.dot_dimension_numbers<[1], [0], [0], [1], [0, 0, 1, 1], [], []>} : vector<8x32xbf16>, vector<32x32xbf16>, vector<8x32xf32> -> vector<8x32xf32>
    %116 = vector.broadcast %31 : vector<1x32xf32> to vector<8x32xf32>
    %117 = arith.addf %115, %116 : vector<8x32xf32>
    %cst_41 = arith.constant 0.000000e+00 : f32
    %118 = vector.broadcast %cst_41 : f32 to vector<8x32xf32>
    %119 = arith.maximumf %117, %118 : vector<8x32xf32>
    %120 = arith.addf %113, %119 : vector<8x32xf32>
    %121 = vector.shape_cast %120 : vector<8x32xf32> to vector<1x8x32xf32>
    %122 = vector.shape_cast %25 : vector<8x32xf32> to vector<1x8x32xf32>
    %123 = arith.mulf %121, %122 : vector<1x8x32xf32>
    %124 = vector.shape_cast %123 : vector<1x8x32xf32> to vector<8x32xf32>
    %125 = arith.truncf %124 : vector<8x32xf32> to vector<8x32xbf16>
    %c0_42 = arith.constant 0 : index
    %c0_43 = arith.constant 0 : index
    %126 = vector.load %arg7[%c0_42, %c0_43] : memref<32x64xbf16, #tpu.memory_space<vmem>>, vector<32x64xbf16>
    %cst_44 = arith.constant dense<0.000000e+00> : vector<8x64xf32>
    %127 = tpu.matmul %125, %126, %cst_44 {dimension_numbers = #tpu.dot_dimension_numbers<[1], [0], [0], [1], [0, 0, 1, 1], [], []>} : vector<8x32xbf16>, vector<32x64xbf16>, vector<8x64xf32> -> vector<8x64xf32>
    %c0_45 = arith.constant 0 : index
    %c0_46 = arith.constant 0 : index
    %128 = vector.load %arg8[%c0_45, %c0_46] : memref<1x64xf32, #tpu.memory_space<vmem>>, vector<1x64xf32>
    %129 = vector.broadcast %128 : vector<1x64xf32> to vector<8x64xf32>
    %130 = arith.addf %127, %129 : vector<8x64xf32>
    %131 = vector.extract_strided_slice %130 {offsets = [0, 0], sizes = [8, 32], strides = [1, 1]} : vector<8x64xf32> to vector<8x32xf32>
    %132 = vector.extract_strided_slice %130 {offsets = [0, 32], sizes = [8, 32], strides = [1, 1]} : vector<8x64xf32> to vector<8x32xf32>
    %133 = vector.shape_cast %10 : vector<16x32xf32> to vector<1x16x32xf32>
    %134 = arith.truncf %133 : vector<1x16x32xf32> to vector<1x16x32xbf16>
    %135 = vector.shape_cast %131 : vector<8x32xf32> to vector<1x8x32xf32>
    %136 = arith.truncf %135 : vector<1x8x32xf32> to vector<1x8x32xbf16>
    %137 = vector.shape_cast %132 : vector<8x32xf32> to vector<1x8x32xf32>
    %138 = arith.truncf %137 : vector<1x8x32xf32> to vector<1x8x32xbf16>
    %139 = vector.extract_strided_slice %134 {offsets = [0, 0, 0], sizes = [1, 16, 8], strides = [1, 1, 1]} : vector<1x16x32xbf16> to vector<1x16x8xbf16>
    %140 = vector.extract_strided_slice %136 {offsets = [0, 0, 0], sizes = [1, 8, 8], strides = [1, 1, 1]} : vector<1x8x32xbf16> to vector<1x8x8xbf16>
    "tpu.trace_start"() <{level = 10 : i32, message = "bqd,bkd->bqk"}> : () -> ()
    %cst_47 = arith.constant dense<0.000000e+00> : vector<1x16x8xf32>
    %141 = tpu.matmul %139, %140, %cst_47 {dimension_numbers = #tpu.dot_dimension_numbers<[2], [2], [1], [1], [0, 0, 0, 1, 1, 1], [0], [0]>} : vector<1x16x8xbf16>, vector<1x8x8xbf16>, vector<1x16x8xf32> -> vector<1x16x8xf32>
    "tpu.trace_stop"() : () -> ()
    %cst_48 = arith.constant dense<0xFF800000> : vector<1x16xf32>
    %142 = vector.multi_reduction <maximumf>, %141, %cst_48 [2] : vector<1x16x8xf32> to vector<1x16xf32>
    %143 = vector.shape_cast %142 : vector<1x16xf32> to vector<1x16x1xf32>
    %144 = vector.broadcast %143 : vector<1x16x1xf32> to vector<1x16x8xf32>
    %145 = arith.subf %141, %144 : vector<1x16x8xf32>
    %146 = math.exp %145 : vector<1x16x8xf32>
    %cst_49 = arith.constant dense<0.000000e+00> : vector<1x16xf32>
    %147 = vector.multi_reduction <add>, %146, %cst_49 [2] : vector<1x16x8xf32> to vector<1x16xf32>
    %148 = vector.shape_cast %147 : vector<1x16xf32> to vector<1x16x1xf32>
    %149 = tpu.reciprocal %148 {approx = true} : vector<1x16x1xf32> -> vector<1x16x1xf32>
    %150 = vector.broadcast %149 : vector<1x16x1xf32> to vector<1x16x8xf32>
    %151 = arith.mulf %146, %150 : vector<1x16x8xf32>
    %152 = arith.truncf %151 : vector<1x16x8xf32> to vector<1x16x8xbf16>
    %153 = vector.extract_strided_slice %138 {offsets = [0, 0, 0], sizes = [1, 8, 8], strides = [1, 1, 1]} : vector<1x8x32xbf16> to vector<1x8x8xbf16>
    "tpu.trace_start"() <{level = 10 : i32, message = "bqk,bkd->bqd"}> : () -> ()
    %cst_50 = arith.constant dense<0.000000e+00> : vector<1x16x8xf32>
    %154 = tpu.matmul %152, %153, %cst_50 {dimension_numbers = #tpu.dot_dimension_numbers<[2], [1], [1], [2], [0, 0, 0, 1, 1, 2], [0], [0]>} : vector<1x16x8xbf16>, vector<1x8x8xbf16>, vector<1x16x8xf32> -> vector<1x16x8xf32>
    "tpu.trace_stop"() : () -> ()
    %155 = vector.extract_strided_slice %134 {offsets = [0, 0, 8], sizes = [1, 16, 8], strides = [1, 1, 1]} : vector<1x16x32xbf16> to vector<1x16x8xbf16>
    %156 = vector.extract_strided_slice %136 {offsets = [0, 0, 8], sizes = [1, 8, 8], strides = [1, 1, 1]} : vector<1x8x32xbf16> to vector<1x8x8xbf16>
    "tpu.trace_start"() <{level = 10 : i32, message = "bqd,bkd->bqk"}> : () -> ()
    %cst_51 = arith.constant dense<0.000000e+00> : vector<1x16x8xf32>
    %157 = tpu.matmul %155, %156, %cst_51 {dimension_numbers = #tpu.dot_dimension_numbers<[2], [2], [1], [1], [0, 0, 0, 1, 1, 1], [0], [0]>} : vector<1x16x8xbf16>, vector<1x8x8xbf16>, vector<1x16x8xf32> -> vector<1x16x8xf32>
    "tpu.trace_stop"() : () -> ()
    %cst_52 = arith.constant dense<0xFF800000> : vector<1x16xf32>
    %158 = vector.multi_reduction <maximumf>, %157, %cst_52 [2] : vector<1x16x8xf32> to vector<1x16xf32>
    %159 = vector.shape_cast %158 : vector<1x16xf32> to vector<1x16x1xf32>
    %160 = vector.broadcast %159 : vector<1x16x1xf32> to vector<1x16x8xf32>
    %161 = arith.subf %157, %160 : vector<1x16x8xf32>
    %162 = math.exp %161 : vector<1x16x8xf32>
    %cst_53 = arith.constant dense<0.000000e+00> : vector<1x16xf32>
    %163 = vector.multi_reduction <add>, %162, %cst_53 [2] : vector<1x16x8xf32> to vector<1x16xf32>
    %164 = vector.shape_cast %163 : vector<1x16xf32> to vector<1x16x1xf32>
    %165 = tpu.reciprocal %164 {approx = true} : vector<1x16x1xf32> -> vector<1x16x1xf32>
    %166 = vector.broadcast %165 : vector<1x16x1xf32> to vector<1x16x8xf32>
    %167 = arith.mulf %162, %166 : vector<1x16x8xf32>
    %168 = arith.truncf %167 : vector<1x16x8xf32> to vector<1x16x8xbf16>
    %169 = vector.extract_strided_slice %138 {offsets = [0, 0, 8], sizes = [1, 8, 8], strides = [1, 1, 1]} : vector<1x8x32xbf16> to vector<1x8x8xbf16>
    "tpu.trace_start"() <{level = 10 : i32, message = "bqk,bkd->bqd"}> : () -> ()
    %cst_54 = arith.constant dense<0.000000e+00> : vector<1x16x8xf32>
    %170 = tpu.matmul %168, %169, %cst_54 {dimension_numbers = #tpu.dot_dimension_numbers<[2], [1], [1], [2], [0, 0, 0, 1, 1, 2], [0], [0]>} : vector<1x16x8xbf16>, vector<1x8x8xbf16>, vector<1x16x8xf32> -> vector<1x16x8xf32>
    "tpu.trace_stop"() : () -> ()
    %171 = vector.extract_strided_slice %134 {offsets = [0, 0, 16], sizes = [1, 16, 8], strides = [1, 1, 1]} : vector<1x16x32xbf16> to vector<1x16x8xbf16>
    %172 = vector.extract_strided_slice %136 {offsets = [0, 0, 16], sizes = [1, 8, 8], strides = [1, 1, 1]} : vector<1x8x32xbf16> to vector<1x8x8xbf16>
    "tpu.trace_start"() <{level = 10 : i32, message = "bqd,bkd->bqk"}> : () -> ()
    %cst_55 = arith.constant dense<0.000000e+00> : vector<1x16x8xf32>
    %173 = tpu.matmul %171, %172, %cst_55 {dimension_numbers = #tpu.dot_dimension_numbers<[2], [2], [1], [1], [0, 0, 0, 1, 1, 1], [0], [0]>} : vector<1x16x8xbf16>, vector<1x8x8xbf16>, vector<1x16x8xf32> -> vector<1x16x8xf32>
    "tpu.trace_stop"() : () -> ()
    %cst_56 = arith.constant dense<0xFF800000> : vector<1x16xf32>
    %174 = vector.multi_reduction <maximumf>, %173, %cst_56 [2] : vector<1x16x8xf32> to vector<1x16xf32>
    %175 = vector.shape_cast %174 : vector<1x16xf32> to vector<1x16x1xf32>
    %176 = vector.broadcast %175 : vector<1x16x1xf32> to vector<1x16x8xf32>
    %177 = arith.subf %173, %176 : vector<1x16x8xf32>
    %178 = math.exp %177 : vector<1x16x8xf32>
    %cst_57 = arith.constant dense<0.000000e+00> : vector<1x16xf32>
    %179 = vector.multi_reduction <add>, %178, %cst_57 [2] : vector<1x16x8xf32> to vector<1x16xf32>
    %180 = vector.shape_cast %179 : vector<1x16xf32> to vector<1x16x1xf32>
    %181 = tpu.reciprocal %180 {approx = true} : vector<1x16x1xf32> -> vector<1x16x1xf32>
    %182 = vector.broadcast %181 : vector<1x16x1xf32> to vector<1x16x8xf32>
    %183 = arith.mulf %178, %182 : vector<1x16x8xf32>
    %184 = arith.truncf %183 : vector<1x16x8xf32> to vector<1x16x8xbf16>
    %185 = vector.extract_strided_slice %138 {offsets = [0, 0, 16], sizes = [1, 8, 8], strides = [1, 1, 1]} : vector<1x8x32xbf16> to vector<1x8x8xbf16>
    "tpu.trace_start"() <{level = 10 : i32, message = "bqk,bkd->bqd"}> : () -> ()
    %cst_58 = arith.constant dense<0.000000e+00> : vector<1x16x8xf32>
    %186 = tpu.matmul %184, %185, %cst_58 {dimension_numbers = #tpu.dot_dimension_numbers<[2], [1], [1], [2], [0, 0, 0, 1, 1, 2], [0], [0]>} : vector<1x16x8xbf16>, vector<1x8x8xbf16>, vector<1x16x8xf32> -> vector<1x16x8xf32>
    "tpu.trace_stop"() : () -> ()
    %187 = vector.extract_strided_slice %134 {offsets = [0, 0, 24], sizes = [1, 16, 8], strides = [1, 1, 1]} : vector<1x16x32xbf16> to vector<1x16x8xbf16>
    %188 = vector.extract_strided_slice %136 {offsets = [0, 0, 24], sizes = [1, 8, 8], strides = [1, 1, 1]} : vector<1x8x32xbf16> to vector<1x8x8xbf16>
    "tpu.trace_start"() <{level = 10 : i32, message = "bqd,bkd->bqk"}> : () -> ()
    %cst_59 = arith.constant dense<0.000000e+00> : vector<1x16x8xf32>
    %189 = tpu.matmul %187, %188, %cst_59 {dimension_numbers = #tpu.dot_dimension_numbers<[2], [2], [1], [1], [0, 0, 0, 1, 1, 1], [0], [0]>} : vector<1x16x8xbf16>, vector<1x8x8xbf16>, vector<1x16x8xf32> -> vector<1x16x8xf32>
    "tpu.trace_stop"() : () -> ()
    %cst_60 = arith.constant dense<0xFF800000> : vector<1x16xf32>
    %190 = vector.multi_reduction <maximumf>, %189, %cst_60 [2] : vector<1x16x8xf32> to vector<1x16xf32>
    %191 = vector.shape_cast %190 : vector<1x16xf32> to vector<1x16x1xf32>
    %192 = vector.broadcast %191 : vector<1x16x1xf32> to vector<1x16x8xf32>
    %193 = arith.subf %189, %192 : vector<1x16x8xf32>
    %194 = math.exp %193 : vector<1x16x8xf32>
    %cst_61 = arith.constant dense<0.000000e+00> : vector<1x16xf32>
    %195 = vector.multi_reduction <add>, %194, %cst_61 [2] : vector<1x16x8xf32> to vector<1x16xf32>
    %196 = vector.shape_cast %195 : vector<1x16xf32> to vector<1x16x1xf32>
    %197 = tpu.reciprocal %196 {approx = true} : vector<1x16x1xf32> -> vector<1x16x1xf32>
    %198 = vector.broadcast %197 : vector<1x16x1xf32> to vector<1x16x8xf32>
    %199 = arith.mulf %194, %198 : vector<1x16x8xf32>
    %200 = arith.truncf %199 : vector<1x16x8xf32> to vector<1x16x8xbf16>
    %201 = vector.extract_strided_slice %138 {offsets = [0, 0, 24], sizes = [1, 8, 8], strides = [1, 1, 1]} : vector<1x8x32xbf16> to vector<1x8x8xbf16>
    "tpu.trace_start"() <{level = 10 : i32, message = "bqk,bkd->bqd"}> : () -> ()
    %cst_62 = arith.constant dense<0.000000e+00> : vector<1x16x8xf32>
    %202 = tpu.matmul %200, %201, %cst_62 {dimension_numbers = #tpu.dot_dimension_numbers<[2], [1], [1], [2], [0, 0, 0, 1, 1, 2], [0], [0]>} : vector<1x16x8xbf16>, vector<1x8x8xbf16>, vector<1x16x8xf32> -> vector<1x16x8xf32>
    "tpu.trace_stop"() : () -> ()
    %203 = tpu.concatenate %154, %170, %186, %202 in 2 : vector<1x16x8xf32>, vector<1x16x8xf32>, vector<1x16x8xf32>, vector<1x16x8xf32> -> vector<1x16x32xf32>
    %204 = vector.shape_cast %203 : vector<1x16x32xf32> to vector<16x32xf32>
    %205 = arith.truncf %204 : vector<16x32xf32> to vector<16x32xbf16>
    %cst_63 = arith.constant dense<0.000000e+00> : vector<16x32xf32>
    %206 = tpu.matmul %205, %28, %cst_63 {dimension_numbers = #tpu.dot_dimension_numbers<[1], [0], [0], [1], [0, 0, 1, 1], [], []>} : vector<16x32xbf16>, vector<32x32xbf16>, vector<16x32xf32> -> vector<16x32xf32>
    %207 = vector.broadcast %32 : vector<1x32xf32> to vector<16x32xf32>
    %208 = arith.addf %206, %207 : vector<16x32xf32>
    %209 = arith.addf %9, %208 : vector<16x32xf32>
    %210 = arith.truncf %209 : vector<16x32xf32> to vector<16x32xbf16>
    %cst_64 = arith.constant dense<0.000000e+00> : vector<16x32xf32>
    %211 = tpu.matmul %210, %29, %cst_64 {dimension_numbers = #tpu.dot_dimension_numbers<[1], [0], [0], [1], [0, 0, 1, 1], [], []>} : vector<16x32xbf16>, vector<32x32xbf16>, vector<16x32xf32> -> vector<16x32xf32>
    %212 = vector.broadcast %33 : vector<1x32xf32> to vector<16x32xf32>
    %213 = arith.addf %211, %212 : vector<16x32xf32>
    %cst_65 = arith.constant 0.000000e+00 : f32
    %214 = vector.broadcast %cst_65 : f32 to vector<16x32xf32>
    %215 = arith.maximumf %213, %214 : vector<16x32xf32>
    %216 = arith.addf %209, %215 : vector<16x32xf32>
    %217 = arith.negf %11 : vector<16x32xf32>
    %218 = math.exp %217 : vector<16x32xf32>
    %cst_66 = arith.constant 1.000000e+00 : f32
    %219 = vector.broadcast %cst_66 : f32 to vector<16x32xf32>
    %220 = arith.addf %219, %218 : vector<16x32xf32>
    %221 = arith.divf %219, %220 : vector<16x32xf32>
    %222 = arith.mulf %11, %221 : vector<16x32xf32>
    %223 = arith.mulf %216, %222 : vector<16x32xf32>
    %224 = arith.truncf %223 : vector<16x32xf32> to vector<16x32xbf16>
    %c0_67 = arith.constant 0 : index
    %c0_68 = arith.constant 0 : index
    %225 = vector.load %arg11[%c0_67, %c0_68] : memref<16x32xbf16, #tpu.memory_space<vmem>>, vector<16x32xbf16>
    tpu.vector_store %arg11[%c0_67, %c0_68], %224 {strides = array<i32>} : memref<16x32xbf16, #tpu.memory_space<vmem>>, vector<16x32xbf16>,
    return
  }
  func.func @transform_0(%arg0: i32) -> (i32, i32) {
    %c0_i32 = arith.constant 0 : i32
    %c0_i32_0 = arith.constant 0 : i32
    return %arg0, %c0_i32 : i32, i32
  }
  func.func @transform_1(%arg0: i32) -> (i32, i32) {
    %c0_i32 = arith.constant 0 : i32
    %c0_i32_0 = arith.constant 0 : i32
    %c0_i32_1 = arith.constant 0 : i32
    return %c0_i32, %c0_i32_0 : i32, i32
  }
  func.func @transform_2(%arg0: i32) -> (i32, i32) {
    %c0_i32 = arith.constant 0 : i32
    %c0_i32_0 = arith.constant 0 : i32
    %c0_i32_1 = arith.constant 0 : i32
    return %c0_i32, %c0_i32_0 : i32, i32
  }
  func.func @transform_3(%arg0: i32) -> (i32, i32) {
    %c0_i32 = arith.constant 0 : i32
    %c0_i32_0 = arith.constant 0 : i32
    %c0_i32_1 = arith.constant 0 : i32
    return %c0_i32, %c0_i32_0 : i32, i32
  }
  func.func @transform_4(%arg0: i32) -> (i32, i32) {
    %c0_i32 = arith.constant 0 : i32
    %c0_i32_0 = arith.constant 0 : i32
    %c0_i32_1 = arith.constant 0 : i32
    return %c0_i32, %c0_i32_0 : i32, i32
  }
  func.func @transform_5(%arg0: i32) -> (i32, i32) {
    %c0_i32 = arith.constant 0 : i32
    %c0_i32_0 = arith.constant 0 : i32
    %c0_i32_1 = arith.constant 0 : i32
    return %c0_i32, %c0_i32_0 : i32, i32
  }
  func.func @transform_6(%arg0: i32) -> (i32, i32) {
    %c0_i32 = arith.constant 0 : i32
    %c0_i32_0 = arith.constant 0 : i32
    %c0_i32_1 = arith.constant 0 : i32
    return %c0_i32, %c0_i32_0 : i32, i32
  }
  func.func @transform_7(%arg0: i32) -> (i32, i32) {
    %c0_i32 = arith.constant 0 : i32
    %c0_i32_0 = arith.constant 0 : i32
    %c0_i32_1 = arith.constant 0 : i32
    return %c0_i32, %c0_i32_0 : i32, i32
  }
  func.func @transform_8(%arg0: i32) -> (i32, i32) {
    %c0_i32 = arith.constant 0 : i32
    %c0_i32_0 = arith.constant 0 : i32
    %c0_i32_1 = arith.constant 0 : i32
    return %c0_i32, %c0_i32_0 : i32, i32
  }
  func.func @transform_9(%arg0: i32) -> (i32, i32) {
    %c0_i32 = arith.constant 0 : i32
    %c0_i32_0 = arith.constant 0 : i32
    %c0_i32_1 = arith.constant 0 : i32
    return %c0_i32, %c0_i32_0 : i32, i32
  }
  func.func @transform_10(%arg0: i32) -> (i32, i32) {
    %c0_i32 = arith.constant 0 : i32
    %c0_i32_0 = arith.constant 0 : i32
    return %arg0, %c0_i32 : i32, i32
  }
}

</mosaic_0001>

<bundles_post_ra>
// kernel: gab_forward.1
= control target key start
LH: loop header
LB: loop body
LE: loop exit
PB: predicated region body
PF: predicated region fallthrough
CT: control target
= control target key end

     0   :  { %s2413_s13 = smov 0   ;;  %s2737_s0 = inlined_call_operand.vmem [shape: bf16[32,32], index: 0, kind: input, shape index: {}]   ;;  %s2738_s1 = inlined_call_operand.vmem [shape: bf16[8,32], index: 1, kind: input, shape index: {}]   ;;  %s2739_s2 = inlined_call_operand.vmem [shape: bf16[32,96], index: 2, kind: input, shape index: {}]   ;;  %s2740_s3 = inlined_call_operand.vmem [shape: f32[1,96], index: 3, kind: input, shape index: {}]   ;;  %s2741_s4 = inlined_call_operand.vmem [shape: bf16[32,160], index: 4, kind: input, shape index: {}]   ;;  %s2742_s5 = inlined_call_operand.vmem [shape: f32[1,160], index: 5, kind: input, shape index: {}]   ;;  %s2743_s6 = inlined_call_operand.vmem [shape: bf16[32,64], index: 6, kind: input, shape index: {}]   ;;  %s2744_s7 = inlined_call_operand.vmem [shape: f32[1,64], index: 7, kind: input, shape index: {}]   ;;  %s2745_s8 = inlined_call_operand.vmem [shape: bf16[128,32], index: 8, kind: input, shape index: {}]   ;;  %s2746_s9 = inlined_call_operand.vmem [shape: f32[4,32], index: 9, kind: input, shape index: {}]   ;;  %s2747_s10 = inlined_call_operand.vmem [shape: bf16[32,32], index: 10, kind: output, shape index: {}]  }
   0x1 LB: > { %s1960_s14 = sadd.s32 4294967295, %s2341_s13   ;;  %p1964_p0 = scmp.ge.s32.totalorder %s2341_s13, 1  ;;  %s2341_s13 = sphi %s2413_s13, %s20_s13  }
   0x2   : > { %p313_p1 = scmp.lt.s32.totalorder %s2341_s13, 3 }
   0x4   : > { %p314_p2 = pnand %p1964_p0, %p313_p1 }
   0x5   : > { %v2256_v0 = vld [vmem:[%s2741_s4 + $0x4] ss:$8 sps:$4 sm:$0xff] (!%p314_p2)   ;;  %v2343_v1 = vmov (!%p314_p2), 0.0   ;;  %vm2344_vm0 = vmmov (!%p314_p2), 0   ;;  %v2259_v3 = vld [vmem:[%s2741_s4] ss:$8 sps:$4 sm:$0xff] (!%p314_p2)   ;;  %v373_v10 = vlaneseq (!%p314_p2) }
   0x6   : > { %317 = sbr.rel (%p314_p2) target bundleno = 3846 (0xf06), region = 60  ;;  %2074 = vmatprep.subr.bf16.mxu1 (!%p314_p2), %v2343_v1  ;;  %v2258_v2 = vld [vmem:[%s2739_s2] sm:$0xff] (!%p314_p2)   ;;  %2078 = vmatprep.mubr.msk.bf16.mxu1 (!%p314_p2), %vm2344_vm0, %v2343_v1  ;;  %v2345_v4 = vmov (!%p314_p2), 0   ;;  %s1965_s21 = sshll.u32 (!%p314_p2), %s1960_s14, 1  ;;  %v2260_v5 = vld [vmem:[%s2741_s4 + $0x14] ss:$8 sps:$4 sm:$0xff] (!%p314_p2)  }
   0x7   : > { %412 = vmatprep.subr.bf16.mxu0 (!%p314_p2), %v2256_v0  ;;  %444 = vmatprep.mubr.bf16.mxu0 (!%p314_p2), %v2345_v4  ;;  %v2262_v6 = vld [vmem:[%s2739_s2 + $0x8] sm:$0xff] (!%p314_p2)   ;;  %v2263_v7 = vld [vmem:[%s2741_s4 + $0x10] ss:$8 sps:$4 sm:$0xff] (!%p314_p2)   ;;  %p352_p3 = scmp.lt.s32.totalorder (!%p314_p2), %s1965_s21, 3  ;;  %v366_v8 = vld [vmem:[%s2738_s1] sm:$0xf] (!%p314_p2) }
   0x8   : > { %2075 = vmatpush3.bf16.msra.mxu1 (!%p314_p2), %v2258_v2  ;;  %413 = vmatpush1.bf16.msra.mxu0 (!%p314_p2), %v2259_v3  ;;  %vm408_vm1 = vcmask (!%p314_p2), 261120   ;;  %v374_v11 = vshrl.u32 (!%p314_p2), %v373_v10, 7  ;;  %v371_v13 = vld [vmem:[%s2742_s5] sm:$0x3] (!%p314_p2)  ;;  %s2346_s19 = smov (!%p314_p2), 88   ;;  %s2347_s20 = smov (!%p314_p2), 96  }
   0x9   : > { %2076 = vmatprep.subr.bf16.mxu1 (!%p314_p2), %v2343_v1  ;;  %414 = vmatprep.subr.bf16.mxu0 (!%p314_p2), %v2260_v5  ;;  %v1975_v16 = vld [vmem:[%s2740_s3] ss:$0 sm:$0xff] (!%p314_p2)  ;;  %vm553_vm2 = vcmask (!%p314_p2), 64512   ;;  %s2348_s22 = smov (!%p314_p2), 112   ;;  %s2349_s23 = smov (!%p314_p2), 120   ;;  %vm600_vm3 = vcmask (!%p314_p2), 130048  }
   0xa   : > { %v379_v12 = vsub.s32 (!%p314_p2), 1, %v374_v11  ;;  %v375_v15 = vsub.s32 (!%p314_p2), 0, %v374_v11  ;;  %s2350_s24 = smov (!%p314_p2), 104   ;;  %s2351_s25 = smov (!%p314_p2), 80   ;;  %vm998_vm4 = vcmask (!%p314_p2), 195584   ;;  %vm1274_vm5 = vcmask (!%p314_p2), 1043456  }
   0xb   : > { %s2352_s26 = smov (!%p314_p2), 72   ;;  %s2353_s27 = smov (!%p314_p2), 8   ;;  %vm1901_vm6 = vcmask (!%p314_p2), 257024  }
   0xc   : > { %2077 = vmatpush3.bf16.msra.mxu1 (!%p314_p2), %v2262_v6  ;;  %415 = vmatpush1.bf16.msra.mxu0 (!%p314_p2), %v2263_v7  ;;  %v380_v14 = vrot.slane (!%p314_p2), %v371_v13, %v379_v12  ;;  %v376_v17 = vrot.slane (!%p314_p2), %v371_v13, %v375_v15  ;;  %s2355_s15 = smov (!%p314_p2), 64   ;;  %s2356_s16 = smov (!%p314_p2), 24  }
   0xd   : > { %s2749_s21 = smov (!%p352_p3, %s1965_s21), 3  ;;  %2088 = vmatprep.subr.bf16.mxu1 %v2343_v1  ;;  %2082 = vmatprep.subr.bf16.mxu0 %v2343_v1  ;;  %s2357_s17 = smov 32  }
   0xe   : > { %s1966_s30 = sshll.u32 %s2749_s21, 2 }
   0xf   : > { %s355_s14 = scalar_lea.vmem %s2737_s0, %s1966_s30  ;;  %2079 = vmatmul.mubr.msk.bf16.vlgmr.msra.gmra.mrb[0].mxu1 %vm408_vm1, %v366_v8  ;;  %s361_s18 = scalar_lea.vmem %s2747_s10, %s1966_s30 }
  0x10   : > { %v2264_v9 = vld [vmem:[%s355_s14] sm:$0xff]   ;;  %2090 = vmatprep.mubr.msk.bf16.mxu1 %vm2344_vm0, %v2343_v1  ;;  %s2354_s14 = smov 16  }
  0x11   : > { %1974 = vmatmul.mubr.msk.bf16.vlgmr.msra.gmra.mrb[0].mxu0 %vm408_vm1, %v2264_v9 }
  0x12   : > { %2084 = vmatprep.mubr.msk.bf16.mxu0 %vm2344_vm0, %v2343_v1 }
  0xe2   : > { %v515_v18 = vpop.f32.mrb[0].mxu1 }
  0xe3   : > { %v2468_v19 = vadd.f32 %v1975_v16, %v515_v18  ;;  %v2080_v20 = vpop.f32.mrb[1].mxu1 }
  0xe4   : > { %v446_v21 = vpop.f32.mrb[0].mxu0  ;;  %v518_v22 = vpop.f32.mrb[2].mxu1 }
  0xe5   : > { %v2470_v23 = vadd.f32 %v446_v21, %v376_v17  ;;  %v448_v24 = vpop.f32.mrb[1].mxu0  ;;  %v2081_v25 = vpop.f32.mrb[3].mxu1  ;;  %v548_v26 = vpack.c.bf16 %v2468_v19, %v2468_v19 }
  0xe6   : > { %v2474_v27 = vadd.f32 %v448_v24, %v380_v14  ;;  %v450_v28 = vpop.f32.mrb[2].mxu0 }
  0xe7   : > { %v2476_v29 = vadd.f32 %v450_v28, %v376_v17  ;;  %v452_v30 = vpop.f32.mrb[3].mxu0  ;;  %660 = vrot.lane.b32.xlu1 %v548_v26, %s2346_s19  ;;  %551 = vrot.lane.b32.xlu0 %v548_v26, %s2347_s20 }
  0xe8   : > { %v2480_v31 = vadd.f32 %v452_v30, %v380_v14 }
  0xe9   : > { %v2484_v32 = vpack.c.bf16 %v2476_v29, %v2470_v23 }
  0xeb   : > { %770 = vrot.lane.b32.xlu1 %v2484_v32, %s2348_s22  ;;  %662 = vrot.lane.b32.xlu0 %v2484_v32, %s2349_s23  ;;  %v558_v33 = vsel %vm553_vm2, %v2484_v32, 0 }
  0xec   : > { %2083 = vmatpush3.bf16.xpose.msra.mxu0 %v558_v33 }
  0xed   : > { %2094 = vmatprep.subr.bf16.mxu0 %v2343_v1 }
  0xef   : > { %878 = vrot.lane.b32.xlu1 %v2484_v32, %s2350_s24  ;;  %768 = vrot.lane.b32.xlu0 %v548_v26, %s2351_s25 }
  0xf3   : > { %876 = vrot.lane.b32.xlu0 %v548_v26, %s2352_s26 }
 0x159   : > { %v552_v34 = vpop.permute.xlu0 %551  ;;  %v661_v35 = vpop.permute.xlu1 %660 }
 0x15a   : > { %2085 = vmatmul.mubr.msk.bf16.vlgmr.msra.gmra.mrb[4].mxu0 %vm553_vm2, %v552_v34 }
 0x15b   : > { %2096 = vmatprep.mubr.msk.bf16.mxu0 %vm2344_vm0, %v2343_v1 }
 0x15d   : > { %v663_v36 = vpop.permute.xlu0 %662  ;;  %v771_v38 = vpop.permute.xlu1 %770 }
 0x15e   : > { %v668_v37 = vsel %vm553_vm2, %v663_v36, 0  ;;  %v776_v39 = vsel %vm553_vm2, %v771_v38, 0 }
 0x15f   : > { %2095 = vmatpush3.bf16.xpose.msra.mxu0 %v668_v37 }
 0x160   : > { %2106 = vmatprep.subr.bf16.mxu0 %v2343_v1 }
 0x161   : > { %v879_v40 = vpop.permute.xlu1 %878  ;;  %v769_v41 = vpop.permute.xlu0 %768 }
 0x162   : > { %v884_v42 = vsel %vm553_vm2, %v879_v40, 0 }
 0x165   : > { %v877_v43 = vpop.permute.xlu0 %876 }
 0x166   : > { %2097 = vmatmul.mubr.msk.bf16.vlgmr.msra.gmra.mrb[8].mxu0 %vm553_vm2, %v661_v35 }
 0x167   : > { %2107 = vmatpush3.bf16.xpose.msra.mxu0 %v776_v39  ;;  %2108 = vmatprep.mubr.msk.bf16.mxu0 %vm2344_vm0, %v2343_v1 }
 0x168   : > { %2118 = vmatprep.subr.bf16.mxu0 %v2343_v1 }
 0x16e   : > { %2109 = vmatmul.mubr.msk.bf16.vlgmr.msra.gmra.mrb[12].mxu0 %vm553_vm2, %v769_v41 }
 0x16f   : > { %2119 = vmatpush3.bf16.xpose.msra.mxu0 %v884_v42  ;;  %2120 = vmatprep.mubr.msk.bf16.mxu0 %vm2344_vm0, %v2343_v1 }
 0x170   : > { %2130 = vmatprep.subr.bf16.mxu0 %v2343_v1 }
 0x176   : > { %2121 = vmatmul.mubr.msk.bf16.vlgmr.msra.gmra.mrb[16].mxu0 %vm553_vm2, %v877_v43 }
 0x177   : > { %2134 = vmatprep.mubr.msk.bf16.mxu0 %vm2344_vm0, %v2343_v1 }
 0x22d   : > { %v594_v44 = vpop.f32.mrb[4].mxu0 }
 0x22e   : > { %v2086_v45 = vpop.f32.mrb[5].mxu0  ;;  %v601_v46 = vsel %vm600_vm3, %v594_v44, -inf }
 0x22f   : > { %602 = vmax.xlane.f32.xlu1 %v601_v46  ;;  %v597_v47 = vpop.f32.mrb[6].mxu0 }
 0x230   : > { %v2087_v48 = vpop.f32.mrb[7].mxu0 }
 0x239   : > { %v704_v49 = vpop.f32.mrb[8].mxu0 }
 0x23a   : > { %v2098_v50 = vpop.f32.mrb[9].mxu0  ;;  %v710_v51 = vsel %vm600_vm3, %v704_v49, -inf }
 0x23b   : > { %711 = vmax.xlane.f32.xlu0 %v710_v51  ;;  %v707_v52 = vpop.f32.mrb[10].mxu0 }
 0x23c   : > { %v2099_v53 = vpop.f32.mrb[11].mxu0 }
 0x241   : > { %v812_v54 = vpop.f32.mrb[12].mxu0 }
 0x242   : > { %v2110_v55 = vpop.f32.mrb[13].mxu0  ;;  %v818_v56 = vsel %vm600_vm3, %v812_v54, -inf }
 0x243   : > { %819 = vmax.xlane.f32.xlu0 %v818_v56  ;;  %v815_v57 = vpop.f32.mrb[14].mxu0  ;;  %v1979_v55 = vmul.f32 -1.442695, %v2468_v19 }
 0x244   : > { %v2111_v58 = vpop.f32.mrb[15].mxu0 }
 0x245   : > { %v2265_v58 = vld [vmem:[%s2745_s8] sm:$0xff]  }
 0x246   : > { %2131 = vmatpush3.bf16.msra.mxu0 %v2265_v58 }
 0x247   : > { %2132 = vmatprep.subr.bf16.mxu0 %v2343_v1 }
 0x249   : > { %v920_v59 = vpop.f32.mrb[16].mxu0 }
 0x24a   : > { %v2122_v60 = vpop.f32.mrb[17].mxu0  ;;  %v926_v61 = vsel %vm600_vm3, %v920_v59, -inf }
 0x24b   : > { %927 = vmax.xlane.f32.xlu1 %v926_v61  ;;  %v923_v62 = vpop.f32.mrb[18].mxu0 }
 0x24c   : > { %v2123_v63 = vpop.f32.mrb[19].mxu0 }
 0x2bc   : > { %v603_v0 = vpop.xlane.xlu1 %602 }
 0x2bd   : > { %v604_v2 = vsub.f32 %v594_v44, %v603_v0 }
 0x2bf   : > { %v605_v3 = vmul.f32 1.442695, %v604_v2 }
 0x2c1   : > { %2275 = vpow2.f32 %v605_v3 }
 0x2c8   : > { %v712_v4 = vpop.xlane.xlu0 %711 }
 0x2c9   : > { %v713_v5 = vsub.f32 %v704_v49, %v712_v4 }
 0x2cb   : > { %v2276_v6 = vpop.eup %2275  ;;  %v714_v7 = vmul.f32 1.442695, %v713_v5 }
 0x2cc   : > { %v607_v8 = vsel %vm600_vm3, %v2276_v6, 0.0 }
 0x2cd   : > { %2277 = vpow2.f32 %v714_v7  ;;  %608 = vadd.xlane.f32.xlu0 %v607_v8 }
 0x2d0   : > { %v820_v9 = vpop.xlane.xlu0 %819 }
 0x2d1   : > { %v821_v10 = vsub.f32 %v812_v54, %v820_v9 }
 0x2d3   : > { %v822_v11 = vmul.f32 1.442695, %v821_v10 }
 0x2d5   : > { %2279 = vpow2.f32 %v822_v11 }
 0x2d7   : > { %v2278_v12 = vpop.eup %2277 }
 0x2d8   : > { %v716_v13 = vsel %vm600_vm3, %v2278_v12, 0.0  ;;  %v928_v16 = vpop.xlane.xlu1 %927 }
 0x2d9   : > { %717 = vadd.xlane.f32.xlu1 %v716_v13  ;;  %v929_v17 = vsub.f32 %v920_v59, %v928_v16  ;;  %v2266_v59 = vld [vmem:[%s2745_s8 + $0x8] sm:$0xff]  }
 0x2da   : > { %2133 = vmatpush3.bf16.msra.mxu0 %v2266_v59 }
 0x2db   : > { %v930_v18 = vmul.f32 1.442695, %v929_v17  ;;  %2146 = vmatprep.subr.bf16.mxu0 %v2343_v1 }
 0x2dd   : > { %2281 = vpow2.f32 %v930_v18 }
 0x2df   : > { %v2280_v14 = vpop.eup %2279 }
 0x2e0   : > { %v824_v15 = vsel %vm600_vm3, %v2280_v14, 0.0 }
 0x2e1   : > { %825 = vadd.xlane.f32.xlu0 %v824_v15  ;;  %v1988_v15 = vld [vmem:[%s2746_s9] ss:$0 sm:$0xff] }
 0x2e7   : > { %v2282_v20 = vpop.eup %2281 }
 0x2e8   : > { %v932_v21 = vsel %vm600_vm3, %v2282_v20, 0.0 }
 0x2ea   : > { %722 = vrot.lane.b32.xlu1 %v2484_v32, %s2346_s19 }
 0x2f7   : > { %614 = vrot.lane.b32.xlu0 %v2484_v32, %s2347_s20 }
 0x2fb   : > { %938 = vrot.lane.b32.xlu0 %v2484_v32, %s2352_s26 }
 0x30e   : > { %933 = vadd.xlane.f32.xlu1 %v932_v21 }
 0x31f   : > { %830 = vrot.lane.b32.xlu1 %v2484_v32, %s2351_s25 }
 0x35a   : > { %v609_v22 = vpop.xlane.xlu0 %608 }
 0x35b   : > { %2283 = vrcp.f32 %v609_v22 }
 0x365   : > { %v2284_v25 = vpop.eup %2283 }
 0x366   : > { %v718_v24 = vpop.xlane.xlu1 %717  ;;  %v611_v28 = vmul.f32 %v2284_v25, %v2276_v6  ;;  %v2269_v25 = vld [vmem:[%s2743_s6] sm:$0xff]  }
 0x367   : > { %2285 = vrcp.f32 %v718_v24 }
 0x368   : > { %v612_v33 = vpack.c.bf16 %v611_v28, %v611_v28 }
 0x36a   : > { %v723_v35 = vpop.permute.xlu1 %722 }
 0x36e   : > { %v826_v26 = vpop.xlane.xlu0 %825 }
 0x36f   : > { %2287 = vrcp.f32 %v826_v26  ;;  %v2270_v26 = vld [vmem:[%s2743_s6 + $0x8] sm:$0xff]  }
 0x371   : > { %v2286_v34 = vpop.eup %2285 }
 0x372   : > { %v615_v30 = vpop.permute.xlu0 %614  ;;  %v720_v36 = vmul.f32 %v2286_v34, %v2278_v12 }
 0x373   : > { %2089 = vmatpush3.bf16.msra.mxu1 %v615_v30 }
 0x374   : > { %2100 = vmatprep.subr.bf16.mxu1 %v2343_v1  ;;  %v721_v37 = vpack.c.bf16 %v720_v36, %v720_v36 }
 0x376   : > { %2091 = vmatmul.mubr.msk.bf16.vlgmr.msra.gmra.mrb[4].mxu1 %vm600_vm3, %v612_v33  ;;  %v939_v43 = vpop.permute.xlu0 %938 }
 0x377   : > { %2101 = vmatpush3.bf16.msra.mxu1 %v723_v35  ;;  %2102 = vmatprep.mubr.msk.bf16.mxu1 %vm2344_vm0, %v2343_v1 }
 0x378   : > { %2112 = vmatprep.subr.bf16.mxu1 %v2343_v1 }
 0x379   : > { %v2288_v38 = vpop.eup %2287 }
 0x37a   : > { %v828_v40 = vmul.f32 %v2288_v38, %v2280_v14  ;;  %v2268_v14 = vld [vmem:[%s2745_s8 + $0x18] sm:$0xff]  }
 0x37c   : > { %v829_v42 = vpack.c.bf16 %v828_v40, %v828_v40 }
 0x37e   : > { %2103 = vmatmul.mubr.msk.bf16.vlgmr.msra.gmra.mrb[8].mxu1 %vm600_vm3, %v721_v37 }
 0x37f   : > { %2114 = vmatprep.mubr.msk.bf16.mxu1 %vm2344_vm0, %v2343_v1 }
 0x39b   : > { %v934_v39 = vpop.xlane.xlu1 %933 }
 0x39c   : > { %2289 = vrcp.f32 %v934_v39 }
 0x39d   : > { %2291 = vpow2.f32 %v1979_v55 }
 0x39f   : > { %v831_v41 = vpop.permute.xlu1 %830 }
 0x3a0   : > { %2113 = vmatpush3.bf16.msra.mxu1 %v831_v41  ;;  %v1996_v41 = vld [vmem:[%s2744_s7] ss:$0 sm:$0xff] }
 0x3a1   : > { %2124 = vmatprep.subr.bf16.mxu1 %v2343_v1 }
 0x3a3   : > { %2115 = vmatmul.mubr.msk.bf16.vlgmr.msra.gmra.mrb[12].mxu1 %vm600_vm3, %v829_v42 }
 0x3a4   : > { %2125 = vmatpush3.bf16.msra.mxu1 %v939_v43  ;;  %2126 = vmatprep.mubr.msk.bf16.mxu1 %vm2344_vm0, %v2343_v1 }
 0x3a5   : > { %2138 = vmatprep.subr.bf16.mxu1 %v2343_v1 }
 0x3a6   : > { %v2290_v44 = vpop.eup %2289 }
 0x3a7   : > { %v936_v45 = vmul.f32 %v2290_v44, %v2282_v20  ;;  %v2292_v56 = vpop.eup %2291 }
 0x3a8   : > { %v524_v57 = vadd.f32 1.0, %v2292_v56 }
 0x3a9   : > { %v937_v46 = vpack.c.bf16 %v936_v45, %v936_v45 }
 0x3aa   : > { %2293 = vrcp.f32 %v524_v57 }
 0x3ab   : > { %2127 = vmatmul.mubr.msk.bf16.vlgmr.msra.gmra.mrb[16].mxu1 %vm600_vm3, %v937_v46 }
 0x3ac   : > { %2142 = vmatprep.mubr.msk.bf16.mxu1 %vm2344_vm0, %v2343_v1 }
 0x3b4   : > { %v2294_v60 = vpop.eup %2293 }
 0x3b5   : > { %v527_v2 = vmul.f32 %v2294_v60, %v2468_v19 }
 0x449   : > { %v654_v47 = vpop.f32.mrb[4].mxu1 }
 0x44a   : > { %v2092_v48 = vpop.f32.mrb[5].mxu1 }
 0x44b   : > { %v657_v49 = vpop.f32.mrb[6].mxu1 }
 0x44c   : > { %v2093_v50 = vpop.f32.mrb[7].mxu1 }
 0x451   : > { %v762_v51 = vpop.f32.mrb[8].mxu1 }
 0x452   : > { %985 = vrot.lane.b32.xlu1 %v762_v51, %s2353_s27  ;;  %v2104_v52 = vpop.f32.mrb[9].mxu1 }
 0x453   : > { %v765_v53 = vpop.f32.mrb[10].mxu1 }
 0x454   : > { %v2105_v54 = vpop.f32.mrb[11].mxu1 }
 0x476   : > { %v870_v61 = vpop.f32.mrb[12].mxu1 }
 0x477   : > { %989 = vrot.lane.b32.xlu0 %v870_v61, %s2354_s14  ;;  %v2116_v62 = vpop.f32.mrb[13].mxu1 }
 0x478   : > { %v873_v63 = vpop.f32.mrb[14].mxu1 }
 0x479   : > { %v2117_v0 = vpop.f32.mrb[15].mxu1 }
 0x47b   : > { %1124 = vrot.lane.b32.xlu0 %v527_v2, %s2355_s15 }
 0x47e   : > { %v978_v3 = vpop.f32.mrb[16].mxu1 }
 0x47f   : > { %993 = vrot.lane.b32.xlu1 %v978_v3, %s2356_s16  ;;  %v2128_v4 = vpop.f32.mrb[17].mxu1 }
 0x480   : > { %v981_v5 = vpop.f32.mrb[18].mxu1 }
 0x481   : > { %v2129_v6 = vpop.f32.mrb[19].mxu1 }
 0x483   : > { %1196 = vrot.lane.b32.xlu1 %v2484_v32, %s2357_s17 }
 0x487   : > { %1319 = vrot.lane.b32.xlu1 %v2484_v32, %s2356_s16 }
 0x48b   : > { %1442 = vrot.lane.b32.xlu1 %v2484_v32, %s2354_s14 }
 0x48f   : > { %1565 = vrot.lane.b32.xlu1 %v2484_v32, %s2353_s27  ;;  %v2267_v32 = vld [vmem:[%s2745_s8 + $0x10] sm:$0xff]  }
 0x490   : > { %2139 = vmatpush3.bf16.msra.mxu1 %v2267_v32 }
 0x491   : > { %2140 = vmatprep.subr.bf16.mxu1 %v2343_v1 }
 0x494   : > { %2141 = vmatpush3.bf16.msra.mxu1 %v2268_v14 }
 0x495   : > { %2154 = vmatprep.subr.bf16.mxu1 %v2343_v1 }
 0x4c4   : > { %v986_v7 = vpop.permute.xlu1 %985 }
 0x4c5   : > { %v996_v9 = vsel %vm553_vm2, %v654_v47, %v986_v7 }
 0x4e9   : > { %v990_v8 = vpop.permute.xlu0 %989 }
 0x4ea   : > { %v997_v10 = vsel %vm600_vm3, %v996_v9, %v990_v8 }
 0x4ed   : > { %v1125_v38 = vpop.permute.xlu0 %1124 }
 0x4f1   : > { %v994_v11 = vpop.permute.xlu1 %993 }
 0x4f2   : > { %v999_v12 = vsel %vm998_vm4, %v997_v10, %v994_v11 }
 0x4f3   : > { %v1000_v13 = vpack.c.bf16 %v999_v12, %v999_v12 }
 0x4f5   : > { %2135 = vmatmul.mubr.msk.bf16.vlgmr.msra.gmra.mrb[20].mxu0 %vm408_vm1, %v1000_v13  ;;  %v1197_v49 = vpop.permute.xlu1 %1196 }
 0x4f6   : > { %2150 = vmatprep.mubr.msk.bf16.mxu0 %vm2344_vm0, %v2343_v1  ;;  %2147 = vmatpush3.bf16.msra.mxu0 %v2269_v25 }
 0x4f7   : > { %2148 = vmatprep.subr.bf16.mxu0 %v2343_v1 }
 0x4f9   : > { %v1320_v53 = vpop.permute.xlu1 %1319 }
 0x4fa   : > { %2149 = vmatpush3.bf16.msra.mxu0 %v2270_v26 }
 0x4fb   : > { %2160 = vmatprep.subr.bf16.mxu0 %v2343_v1 }
 0x4fd   : > { %v1443_v56 = vpop.permute.xlu1 %1442 }
 0x501   : > { %v1566_v58 = vpop.permute.xlu1 %1565 }
 0x5c8   : > { %v1054_v16 = vpop.f32.mrb[20].mxu0 }
 0x5c9   : > { %v1055_v17 = vadd.f32 %v1988_v15, %v1054_v16  ;;  %v2136_v18 = vpop.f32.mrb[21].mxu0 }
 0x5ca   : > { %v1057_v20 = vpop.f32.mrb[22].mxu0 }
 0x5cb   : > { %v1060_v21 = vadd.f32 %v1055_v17, %v2468_v19  ;;  %v2137_v22 = vpop.f32.mrb[23].mxu0  ;;  %v1992_v19 = vld [vmem:[%s2746_s9 + $0x1] ss:$0 sm:$0xff] }
 0x5cd   : > { %v1061_v24 = vpack.c.bf16 %v1060_v21, %v1060_v21 }
 0x5cf   : > { %2143 = vmatmul.mubr.msk.bf16.vlgmr.msra.gmra.mrb[20].mxu1 %vm408_vm1, %v1061_v24 }
 0x5d0   : > { %2156 = vmatprep.mubr.msk.bf16.mxu1 %vm2344_vm0, %v2343_v1 }
 0x6a2   : > { %v1115_v28 = vpop.f32.mrb[20].mxu1 }
 0x6a3   : > { %v1116_v30 = vadd.f32 %v1992_v19, %v1115_v28  ;;  %v2144_v33 = vpop.f32.mrb[21].mxu1 }
 0x6a4   : > { %v1118_v34 = vpop.f32.mrb[22].mxu1 }
 0x6a5   : > { %v1121_v35 = vmax.f32 %v1116_v30, 0.0  ;;  %v2145_v36 = vpop.f32.mrb[23].mxu1 }
 0x6a7   : > { %v1122_v37 = vadd.f32 %v1121_v35, %v1060_v21 }
 0x6a9   : > { %v1127_v39 = vmul.f32 %v1125_v38, %v1122_v37 }
 0x6ab   : > { %v1128_v40 = vpack.c.bf16 %v1127_v39, %v1127_v39 }
 0x6ad   : > { %2151 = vmatmul.mubr.msk.bf16.vlgmr.msra.gmra.mrb[24].mxu0 %vm408_vm1, %v1128_v40 }
 0x6ae   : > { %2162 = vmatprep.mubr.msk.bf16.mxu0 %vm2344_vm0, %v2343_v1 }
 0x780   : > { %v1189_v42 = vpop.f32.mrb[24].mxu0 }
 0x781   : > { %v1190_v43 = vadd.f32 %v1996_v41, %v1189_v42  ;;  %v2152_v44 = vpop.f32.mrb[25].mxu0 }
 0x782   : > { %v1192_v45 = vpop.f32.mrb[26].mxu0 }
 0x783   : > { %v2606_v46 = vpack.c.bf16 %v1190_v43, %v1190_v43  ;;  %v2153_v47 = vpop.f32.mrb[27].mxu0 }
 0x785   : > { %1321 = vrot.lane.b32.xlu0 %v2606_v46, %s2349_s23  ;;  %v1202_v48 = vsel %vm553_vm2, %v2606_v46, 0 }
 0x786   : > { %2155 = vmatpush3.bf16.xpose.msra.mxu1 %v1202_v48 }
 0x787   : > { %2166 = vmatprep.subr.bf16.mxu1 %v2343_v1 }
 0x789   : > { %1444 = vrot.lane.b32.xlu0 %v2606_v46, %s2348_s22 }
 0x78d   : > { %1567 = vrot.lane.b32.xlu0 %v2606_v46, %s2350_s24  ;;  %2157 = vmatmul.mubr.msk.bf16.vlgmr.msra.gmra.mrb[24].mxu1 %vm553_vm2, %v1197_v49 }
 0x78e   : > { %2168 = vmatprep.mubr.msk.bf16.mxu1 %vm2344_vm0, %v2343_v1 }
 0x7f7   : > { %v1322_v50 = vpop.permute.xlu0 %1321 }
 0x7f8   : > { %v1327_v51 = vsel %vm553_vm2, %v1322_v50, 0 }
 0x7f9   : > { %2167 = vmatpush3.bf16.xpose.msra.mxu1 %v1327_v51 }
 0x7fa   : > { %2178 = vmatprep.subr.bf16.mxu1 %v2343_v1 }
 0x7fb   : > { %v1445_v52 = vpop.permute.xlu0 %1444 }
 0x7fc   : > { %v1450_v54 = vsel %vm553_vm2, %v1445_v52, 0 }
 0x7ff   : > { %v1568_v55 = vpop.permute.xlu0 %1567 }
 0x800   : > { %2169 = vmatmul.mubr.msk.bf16.vlgmr.msra.gmra.mrb[28].mxu1 %vm553_vm2, %v1320_v53  ;;  %v1573_v57 = vsel %vm553_vm2, %v1568_v55, 0 }
 0x801   : > { %2179 = vmatpush3.bf16.xpose.msra.mxu1 %v1450_v54  ;;  %2180 = vmatprep.mubr.msk.bf16.mxu1 %vm2344_vm0, %v2343_v1 }
 0x802   : > { %2190 = vmatprep.subr.bf16.mxu1 %v2343_v1 }
 0x808   : > { %2181 = vmatmul.mubr.msk.bf16.vlgmr.msra.gmra.mrb[32].mxu1 %vm553_vm2, %v1443_v56 }
 0x809   : > { %2191 = vmatpush3.bf16.xpose.msra.mxu1 %v1573_v57  ;;  %2192 = vmatprep.mubr.msk.bf16.mxu1 %vm2344_vm0, %v2343_v1 }
 0x80a   : > { %2202 = vmatprep.subr.bf16.mxu1 %v2343_v1 }
 0x810   : > { %2193 = vmatmul.mubr.msk.bf16.vlgmr.msra.gmra.mrb[36].mxu1 %vm553_vm2, %v1566_v58 }
 0x811   : > { %2206 = vmatprep.mubr.msk.bf16.mxu1 %vm2344_vm0, %v2343_v1 }
 0x860   : > { %v1238_v59 = vpop.f32.mrb[24].mxu1 }
 0x861   : > { %v2158_v60 = vpop.f32.mrb[25].mxu1  ;;  %v1245_v61 = vsel %vm553_vm2, %v1238_v59, -inf }
 0x862   : > { %1246 = vmax.xlane.f32.xlu0 %v1245_v61  ;;  %v1241_v62 = vpop.f32.mrb[26].mxu1 }
 0x863   : > { %v2159_v63 = vpop.f32.mrb[27].mxu1  ;;  %v1248_v0 = vsel %vm553_vm2, %v1241_v62, -inf }
 0x864   : > { %1249 = vmax.xlane.f32.xlu1 %v1248_v0 }
 0x8d3   : > { %v1363_v2 = vpop.f32.mrb[28].mxu1 }
 0x8d4   : > { %v2170_v3 = vpop.f32.mrb[29].mxu1  ;;  %v1370_v4 = vsel %vm553_vm2, %v1363_v2, -inf }
 0x8d5   : > { %1371 = vmax.xlane.f32.xlu0 %v1370_v4  ;;  %v1366_v5 = vpop.f32.mrb[30].mxu1 }
 0x8d6   : > { %v2171_v6 = vpop.f32.mrb[31].mxu1  ;;  %v1373_v7 = vsel %vm553_vm2, %v1366_v5, -inf }
 0x8d9   : > { %1374 = vmax.xlane.f32.xlu0 %v1373_v7 }
 0x8db   : > { %v1486_v8 = vpop.f32.mrb[32].mxu1 }
 0x8dc   : > { %v2182_v9 = vpop.f32.mrb[33].mxu1  ;;  %v1493_v10 = vsel %vm553_vm2, %v1486_v8, -inf }
 0x8dd   : > { %1494 = vmax.xlane.f32.xlu1 %v1493_v10  ;;  %v1489_v11 = vpop.f32.mrb[34].mxu1 }
 0x8de   : > { %v2183_v12 = vpop.f32.mrb[35].mxu1  ;;  %v1496_v13 = vsel %vm553_vm2, %v1489_v11, -inf }
 0x8df   : > { %1497 = vmax.xlane.f32.xlu0 %v1496_v13 }
 0x8e3   : > { %v1609_v32 = vpop.f32.mrb[36].mxu1 }
 0x8e4   : > { %v2194_v14 = vpop.f32.mrb[37].mxu1  ;;  %v1616_v15 = vsel %vm553_vm2, %v1609_v32, -inf }
 0x8e5   : > { %1617 = vmax.xlane.f32.xlu1 %v1616_v15  ;;  %v1612_v16 = vpop.f32.mrb[38].mxu1 }
 0x8e6   : > { %v2195_v17 = vpop.f32.mrb[39].mxu1  ;;  %v1619_v18 = vsel %vm553_vm2, %v1612_v16, -inf }
 0x8e7   : > { %1620 = vmax.xlane.f32.xlu0 %v1619_v18 }
 0x8ef   : > { %v1247_v25 = vpop.xlane.xlu0 %1246 }
 0x8f0   : > { %v1251_v19 = vsub.f32 %v1238_v59, %v1247_v25 }
 0x8f1   : > { %v1250_v20 = vpop.xlane.xlu1 %1249 }
 0x8f2   : > { %v1252_v21 = vsub.f32 %v1241_v62, %v1250_v20  ;;  %v1253_v28 = vmul.f32 1.442695, %v1251_v19 }
 0x8f4   : > { %v1255_v22 = vmul.f32 1.442695, %v1252_v21 }
 0x8f6   : > { %2295 = vpow2.f32 %v1255_v22  ;;  %1269 = vrot.lane.b32.xlu1 %v2606_v46, %s2347_s20 }
 0x8f7   : > { %2297 = vpow2.f32 %v1253_v28 }
 0x900   : > { %v2645_v24 = vpop.eup %2295 }
 0x901   : > { %v1260_v26 = vsel %vm553_vm2, %v2645_v24, 0.0  ;;  %v2298_v30 = vpop.eup %2297 }
 0x902   : > { %1261 = vadd.xlane.f32.xlu0 %v1260_v26  ;;  %v1257_v33 = vsel %vm553_vm2, %v2298_v30, 0.0 }
 0x91a   : > { %1258 = vadd.xlane.f32.xlu1 %v1257_v33 }
 0x962   : > { %v1372_v34 = vpop.xlane.xlu0 %1371 }
 0x963   : > { %v1376_v35 = vsub.f32 %v1363_v2, %v1372_v34 }
 0x965   : > { %v1378_v36 = vmul.f32 1.442695, %v1376_v35 }
 0x966   : > { %v1375_v37 = vpop.xlane.xlu0 %1374 }
 0x967   : > { %2299 = vpow2.f32 %v1378_v36  ;;  %v1377_v38 = vsub.f32 %v1366_v5, %v1375_v37 }
 0x969   : > { %v1380_v39 = vmul.f32 1.442695, %v1377_v38 }
 0x96a   : > { %v1495_v40 = vpop.xlane.xlu1 %1494 }
 0x96b   : > { %2301 = vpow2.f32 %v1380_v39  ;;  %v1499_v41 = vsub.f32 %v1486_v8, %v1495_v40 }
 0x96c   : > { %v1498_v42 = vpop.xlane.xlu0 %1497 }
 0x96d   : > { %v1501_v43 = vmul.f32 1.442695, %v1499_v41  ;;  %v1500_v44 = vsub.f32 %v1489_v11, %v1498_v42 }
 0x96f   : > { %2303 = vpow2.f32 %v1501_v43  ;;  %v1503_v45 = vmul.f32 1.442695, %v1500_v44 }
 0x971   : > { %v2300_v47 = vpop.eup %2299  ;;  %2305 = vpow2.f32 %v1503_v45 }
 0x972   : > { %v1618_v48 = vpop.xlane.xlu1 %1617  ;;  %v1382_v49 = vsel %vm553_vm2, %v2300_v47, 0.0 }
 0x973   : > { %v1622_v50 = vsub.f32 %v1609_v32, %v1618_v48  ;;  %1383 = vadd.xlane.f32.xlu1 %v1382_v49  ;;  %v2271_v49 = vld [vmem:[%s2745_s8 + $0x20] sm:$0xff]  }
 0x974   : > { %v1621_v51 = vpop.xlane.xlu0 %1620  ;;  %2203 = vmatpush3.bf16.msra.mxu1 %v2271_v49 }
 0x975   : > { %v2302_v52 = vpop.eup %2301  ;;  %v1624_v53 = vmul.f32 1.442695, %v1622_v50  ;;  %v1623_v54 = vsub.f32 %v1612_v16, %v1621_v51  ;;  %2204 = vmatprep.subr.bf16.mxu1 %v2343_v1 }
 0x976   : > { %v1270_v55 = vpop.permute.xlu1 %1269  ;;  %v1385_v56 = vsel %vm553_vm2, %v2302_v52, 0.0 }
 0x977   : > { %2307 = vpow2.f32 %v1624_v53  ;;  %v1626_v57 = vmul.f32 1.442695, %v1623_v54  ;;  %v1276_v58 = vsel %vm1274_vm5, %v1270_v55, 0  ;;  %1386 = vadd.xlane.f32.xlu0 %v1385_v56  ;;  %v2272_v54 = vld [vmem:[%s2745_s8 + $0x28] sm:$0xff]  }
 0x978   : > { %2161 = vmatpush3.bf16.msra.mxu0 %v1276_v58  ;;  %2205 = vmatpush3.bf16.msra.mxu1 %v2272_v54 }
 0x979   : > { %v2304_v59 = vpop.eup %2303  ;;  %2309 = vpow2.f32 %v1626_v57  ;;  %2172 = vmatprep.subr.bf16.mxu0 %v2343_v1 }
 0x97a   : > { %v1505_v60 = vsel %vm553_vm2, %v2304_v59, 0.0 }
 0x97b   : > { %v2306_v61 = vpop.eup %2305  ;;  %1506 = vadd.xlane.f32.xlu1 %v1505_v60 }
 0x97c   : > { %v1508_v62 = vsel %vm553_vm2, %v2306_v61, 0.0 }
 0x97d   : > { %1509 = vadd.xlane.f32.xlu0 %v1508_v62 }
 0x981   : > { %v2308_v63 = vpop.eup %2307 }
 0x982   : > { %v1628_v0 = vsel %vm553_vm2, %v2308_v63, 0.0 }
 0x983   : > { %v2310_v2 = vpop.eup %2309  ;;  %1629 = vadd.xlane.f32.xlu1 %v1628_v0 }
 0x984   : > { %v1631_v3 = vsel %vm553_vm2, %v2310_v2, 0.0 }
 0x985   : > { %1632 = vadd.xlane.f32.xlu0 %v1631_v3 }
 0x98f   : > { %v1262_v4 = vpop.xlane.xlu0 %1261 }
 0x990   : > { %2311 = vrcp.f32 %v1262_v4 }
 0x994   : > { %1516 = vrot.lane.b32.xlu1 %v2606_v46, %s2351_s25 }
 0x998   : > { %1639 = vrot.lane.b32.xlu1 %v2606_v46, %s2352_s26 }
 0x99a   : > { %v2312_v6 = vpop.eup %2311 }
 0x99b   : > { %1393 = vrot.lane.b32.xlu0 %v2606_v46, %s2346_s19  ;;  %v1266_v8 = vmul.f32 %v2312_v6, %v2645_v24 }
 0x9a7   : > { %v1259_v5 = vpop.xlane.xlu1 %1258 }
 0x9a8   : > { %2313 = vrcp.f32 %v1259_v5 }
 0x9b2   : > { %v2314_v7 = vpop.eup %2313 }
 0x9b3   : > { %v1265_v9 = vmul.f32 %v2314_v7, %v2298_v30 }
 0x9b5   : > { %v1267_v10 = vpack.c.bf16 %v1266_v8, %v1265_v9 }
 0x9b7   : > { %2163 = vmatmul.mubr.msk.bf16.vlgmr.msra.gmra.mrb[28].mxu0 %vm553_vm2, %v1267_v10 }
 0x9b8   : > { %2174 = vmatprep.mubr.msk.bf16.mxu0 %vm2344_vm0, %v2343_v1 }
 0xa00   : > { %v1384_v12 = vpop.xlane.xlu1 %1383 }
 0xa04   : > { %v1387_v11 = vpop.xlane.xlu0 %1386 }
 0xa05   : > { %2315 = vrcp.f32 %v1387_v11 }
 0xa06   : > { %2317 = vrcp.f32 %v1384_v12 }
 0xa08   : > { %v1507_v13 = vpop.xlane.xlu1 %1506 }
 0xa0a   : > { %v1510_v46 = vpop.xlane.xlu0 %1509 }
 0xa0b   : > { %2319 = vrcp.f32 %v1510_v46 }
 0xa0c   : > { %2321 = vrcp.f32 %v1507_v13 }
 0xa0f   : > { %v2316_v32 = vpop.eup %2315 }
 0xa10   : > { %v1630_v14 = vpop.xlane.xlu1 %1629  ;;  %v2318_v16 = vpop.eup %2317  ;;  %v1391_v17 = vmul.f32 %v2316_v32, %v2302_v52 }
 0xa11   : > { %v1390_v20 = vmul.f32 %v2318_v16, %v2300_v47  ;;  %v2274_v16 = vld [vmem:[%s2745_s8 + $0x38] sm:$0xff]  }
 0xa12   : > { %v1633_v15 = vpop.xlane.xlu0 %1632 }
 0xa13   : > { %2323 = vrcp.f32 %v1633_v15  ;;  %v1392_v24 = vpack.c.bf16 %v1391_v17, %v1390_v20  ;;  %v2008_v15 = vld [vmem:[%s2746_s9 + $0x2] ss:$0 sm:$0xff] }
 0xa14   : > { %v1517_v22 = vpop.permute.xlu1 %1516  ;;  %2325 = vrcp.f32 %v1630_v14  ;;  %v2273_v14 = vld [vmem:[%s2745_s8 + $0x30] sm:$0xff]  }
 0xa15   : > { %v2320_v25 = vpop.eup %2319  ;;  %v1522_v26 = vsel %vm1274_vm5, %v1517_v22, 0 }
 0xa16   : > { %v1394_v18 = vpop.permute.xlu0 %1393  ;;  %v2322_v19 = vpop.eup %2321  ;;  %v1514_v28 = vmul.f32 %v2320_v25, %v2306_v61 }
 0xa17   : > { %v1399_v21 = vsel %vm1274_vm5, %v1394_v18, 0  ;;  %v1513_v30 = vmul.f32 %v2322_v19, %v2304_v59 }
 0xa18   : > { %2173 = vmatpush3.bf16.msra.mxu0 %v1399_v21  ;;  %v1640_v33 = vpop.permute.xlu1 %1639 }
 0xa19   : > { %2184 = vmatprep.subr.bf16.mxu0 %v2343_v1  ;;  %v1515_v34 = vpack.c.bf16 %v1514_v28, %v1513_v30  ;;  %v1645_v36 = vsel %vm1274_vm5, %v1640_v33, 0  ;;  %v2016_v33 = vmul.f32 -1.442695, %v2474_v27 }
 0xa1b   : > { %2175 = vmatmul.mubr.msk.bf16.vlgmr.msra.gmra.mrb[32].mxu0 %vm553_vm2, %v1392_v24  ;;  %2327 = vpow2.f32 %v2016_v33 }
 0xa1c   : > { %2185 = vmatpush3.bf16.msra.mxu0 %v1522_v26  ;;  %2186 = vmatprep.mubr.msk.bf16.mxu0 %vm2344_vm0, %v2343_v1 }
 0xa1d   : > { %2196 = vmatprep.subr.bf16.mxu0 %v2343_v1  ;;  %v2324_v35 = vpop.eup %2323 }
 0xa1e   : > { %v2326_v37 = vpop.eup %2325  ;;  %v1637_v38 = vmul.f32 %v2324_v35, %v2310_v2 }
 0xa1f   : > { %v1636_v39 = vmul.f32 %v2326_v37, %v2308_v63 }
 0xa21   : > { %v1638_v40 = vpack.c.bf16 %v1637_v38, %v1636_v39 }
 0xa23   : > { %2187 = vmatmul.mubr.msk.bf16.vlgmr.msra.gmra.mrb[36].mxu0 %vm553_vm2, %v1515_v34  ;;  %v2017_v34 = vmul.f32 -1.442695, %v2480_v31 }
 0xa24   : > { %2197 = vmatpush3.bf16.msra.mxu0 %v1645_v36  ;;  %2198 = vmatprep.mubr.msk.bf16.mxu0 %vm2344_vm0, %v2343_v1 }
 0xa25   : > { %2210 = vmatprep.subr.bf16.mxu0 %v2343_v1  ;;  %2329 = vpow2.f32 %v2017_v34  ;;  %v2328_v35 = vpop.eup %2327 }
 0xa26   : > { %v1871_v37 = vadd.f32 1.0, %v2328_v35 }
 0xa28   : > { %2331 = vrcp.f32 %v1871_v37 }
 0xa2b   : > { %2199 = vmatmul.mubr.msk.bf16.vlgmr.msra.gmra.mrb[40].mxu0 %vm553_vm2, %v1638_v40 }
 0xa2c   : > { %2214 = vmatprep.mubr.msk.bf16.mxu0 %vm2344_vm0, %v2343_v1  ;;  %2211 = vmatpush3.bf16.msra.mxu0 %v2273_v14 }
 0xa2d   : > { %2212 = vmatprep.subr.bf16.mxu0 %v2343_v1 }
 0xa2f   : > { %v2330_v36 = vpop.eup %2329 }
 0xa30   : > { %2213 = vmatpush3.bf16.msra.mxu0 %v2274_v16  ;;  %v1872_v38 = vadd.f32 1.0, %v2330_v36 }
 0xa32   : > { %2333 = vrcp.f32 %v1872_v38 }
 0xa8a   : > { %v1312_v41 = vpop.f32.mrb[28].mxu0 }
 0xa8b   : > { %v2164_v42 = vpop.f32.mrb[29].mxu0 }
 0xa8c   : > { %v1315_v43 = vpop.f32.mrb[30].mxu0 }
 0xa8d   : > { %v2165_v44 = vpop.f32.mrb[31].mxu0 }
 0xaee   : > { %v1435_v45 = vpop.f32.mrb[32].mxu0 }
 0xaef   : > { %v2176_v47 = vpop.f32.mrb[33].mxu0 }
 0xaf0   : > { %v1438_v48 = vpop.f32.mrb[34].mxu0 }
 0xaf1   : > { %v2241_v50 = vpack.i.bf16 %v1438_v48, %v1435_v45  ;;  %v2177_v51 = vpop.f32.mrb[35].mxu0  ;;  %v2332_v45 = vpop.eup %2331 }
 0xaf2   : > { %v2334_v48 = vpop.eup %2333  ;;  %v1877_v49 = vmul.f32 %v2332_v45, %v2474_v27 }
 0xaf3   : > { %2242 = vrot.lane.b32.xlu0 %v2241_v50, %s2353_s27  ;;  %v1878_v50 = vmul.f32 %v2334_v48, %v2480_v31 }
 0xaf6   : > { %v1558_v52 = vpop.f32.mrb[36].mxu0 }
 0xaf7   : > { %v2188_v53 = vpop.f32.mrb[37].mxu0 }
 0xaf8   : > { %v1561_v55 = vpop.f32.mrb[38].mxu0 }
 0xaf9   : > { %v2246_v56 = vpack.i.bf16 %v1561_v55, %v1558_v52  ;;  %v2189_v57 = vpop.f32.mrb[39].mxu0 }
 0xafb   : > { %2247 = vrot.lane.b32.xlu1 %v2246_v56, %s2354_s14 }
 0xafe   : > { %v1681_v58 = vpop.f32.mrb[40].mxu0 }
 0xaff   : > { %v2200_v59 = vpop.f32.mrb[41].mxu0 }
 0xb00   : > { %v1684_v60 = vpop.f32.mrb[42].mxu0 }
 0xb01   : > { %v2251_v61 = vpack.i.bf16 %v1684_v60, %v1681_v58  ;;  %v2201_v62 = vpop.f32.mrb[43].mxu0 }
 0xb03   : > { %2252 = vrot.lane.b32.xlu0 %v2251_v61, %s2356_s16 }
 0xb65   : > { %v2243_v63 = vpop.permute.xlu0 %2242 }
 0xb66   : > { %v2245_v2 = vunpack.i.h.bf16 %v2243_v63  ;;  %v2244_v3 = vunpack.i.l.bf16 %v2243_v63 }
 0xb68   : > { %v1713_v7 = vsel %vm553_vm2, %v1315_v43, %v2245_v2  ;;  %v1712_v8 = vsel %vm553_vm2, %v1312_v41, %v2244_v3 }
 0xb6d   : > { %v2248_v0 = vpop.permute.xlu1 %2247 }
 0xb6e   : > { %v2250_v4 = vunpack.i.h.bf16 %v2248_v0  ;;  %v2249_v5 = vunpack.i.l.bf16 %v2248_v0 }
 0xb70   : > { %v1715_v11 = vsel %vm600_vm3, %v1713_v7, %v2250_v4  ;;  %v1714_v12 = vsel %vm600_vm3, %v1712_v8, %v2249_v5 }
 0xb75   : > { %v2253_v6 = vpop.permute.xlu0 %2252 }
 0xb76   : > { %v2255_v9 = vunpack.i.h.bf16 %v2253_v6  ;;  %v2254_v10 = vunpack.i.l.bf16 %v2253_v6 }
 0xb78   : > { %v1717_v46 = vsel %vm998_vm4, %v1715_v11, %v2255_v9  ;;  %v1716_v13 = vsel %vm998_vm4, %v1714_v12, %v2254_v10 }
 0xb79   : > { %v1718_v32 = vpack.c.bf16 %v1717_v46, %v1716_v13 }
 0xb7b   : > { %2207 = vmatmul.mubr.msk.bf16.vlgmr.msra.gmra.mrb[40].mxu1 %vm408_vm1, %v1718_v32 }
 0xc4e   : > { %v1772_v17 = vpop.f32.mrb[40].mxu1 }
 0xc4f   : > { %v1773_v18 = vadd.f32 %v2008_v15, %v1772_v17  ;;  %v2208_v20 = vpop.f32.mrb[41].mxu1 }
 0xc50   : > { %v1775_v21 = vpop.f32.mrb[42].mxu1 }
 0xc51   : > { %v1776_v22 = vadd.f32 %v2008_v15, %v1775_v21  ;;  %1781 = vrot.lane.b32.xlu1 %v1773_v18, %s2355_s15  ;;  %v2209_v24 = vpop.f32.mrb[43].mxu1 }
 0xc53   : > { %1783 = vrot.lane.b32.xlu0 %v1776_v22, %s2355_s15 }
 0xcc3   : > { %v1782_v25 = vpop.permute.xlu1 %1781 }
 0xcc4   : > { %v1787_v19 = vadd.f32 %v1782_v25, %v2470_v23  ;;  %v2012_v23 = vld [vmem:[%s2746_s9 + $0x3] ss:$0 sm:$0xff] }
 0xcc5   : > { %v1784_v26 = vpop.permute.xlu0 %1783 }
 0xcc6   : > { %v1788_v28 = vadd.f32 %v1784_v26, %v2476_v29 }
 0xcc8   : > { %v1789_v30 = vpack.c.bf16 %v1788_v28, %v1787_v19 }
 0xcca   : > { %1795 = vrot.lane.b32.xlu1 %v1789_v30, %s2355_s15 }
 0xd3c   : > { %v1796_v1 = vpop.permute.xlu1 %1795 }
 0xd3d   : > { %2215 = vmatmul.mubr.msk.bf16.vlgmr.msra.gmra.mrb[44].mxu0 %vm408_vm1, %v1796_v1 }
 0xe10   : > { %v1846_v29 = vpop.f32.mrb[44].mxu0 }
 0xe11   : > { %v1847_v39 = vadd.f32 %v2012_v23, %v1846_v29  ;;  %v2216_v40 = vpop.f32.mrb[45].mxu0 }
 0xe12   : > { %v1849_v41 = vpop.f32.mrb[46].mxu0 }
 0xe13   : > { %v1853_v42 = vmax.f32 %v1847_v39, 0.0  ;;  %v1850_v43 = vadd.f32 %v2012_v23, %v1849_v41  ;;  %v2217_v44 = vpop.f32.mrb[47].mxu0 }
 0xe15   : > { %v1854_v47 = vmax.f32 %v1850_v43, 0.0  ;;  %1857 = vrot.lane.b32.xlu0 %v1853_v42, %s2355_s15 }
 0xe17   : > { %1859 = vrot.lane.b32.xlu1 %v1854_v47, %s2355_s15 }
 0xe19   : > { %1881 = vrot.lane.b32.xlu0 %v1877_v49, %s2355_s15 }
 0xe1b   : > { %1883 = vrot.lane.b32.xlu1 %v1878_v50, %s2355_s15 }
 0xe87   : > { %v1858_v51 = vpop.permute.xlu0 %1857 }
 0xe88   : > { %v1863_v53 = vadd.f32 %v1858_v51, %v1787_v19 }
 0xe89   : > { %v1860_v52 = vpop.permute.xlu1 %1859 }
 0xe8a   : > { %v1864_v55 = vadd.f32 %v1860_v52, %v1788_v28 }
 0xe8b   : > { %v1882_v54 = vpop.permute.xlu0 %1881 }
 0xe8c   : > { %v1887_v56 = vmul.f32 %v1882_v54, %v1863_v53 }
 0xe8d   : > { %v1884_v57 = vpop.permute.xlu1 %1883 }
 0xe8e   : > { %v2022_v58 = vpack.c.bf16 %v1887_v56, %v1887_v56  ;;  %v1888_v59 = vmul.f32 %v1884_v57, %v1864_v55 }
 0xe90   : > { %v2023_v60 = vpack.c.bf16 %v1888_v59, %v1888_v59  ;;  %1895 = vrot.lane.b32.xlu0 %v2022_v58, %s2355_s15 }
 0xe92   : > { %1897 = vrot.lane.b32.xlu1 %v2023_v60, %s2355_s15 }
 0xf02   : > { %v1896_v27 = vpop.permute.xlu0 %1895 }
 0xf03   : > { %1902 = vst.msk [vmem:[%s361_s18] sm:$0xf] %vm1901_vm6, %v1896_v27 }
 0xf04   : > { %v1898_v31 = vpop.permute.xlu1 %1897 }
 0xf05   : > { %1903 = vst.msk [vmem:[%s361_s18 + $0x4] sm:$0xf] %vm1901_vm6, %v1898_v31 }
 0xf06 PF: > { %s20_s13 = sadd.s32 1, %s2341_s13  }
 0xf07   : > { %p17_p4 = scmp.ge.s32.totalorder %s20_s13, 4  }
 0xf09   :  { %19 = sbr.rel (!%p17_p4) target bundleno = 1 (0x1), region = 90 }

</bundles_post_ra>
